<compile_context>
chip_gen: v5e
topology: v5e:2x2
jax: 0.10.0
libtpu: 0.0.40
codegen_flags: <defaults>
</compile_context>

<pallas_src>
import jax
import jax.numpy as jnp
from jax.experimental import pallas as pl
from jax.experimental.pallas import tpu as pltpu

# ----------------------------- config ---------------------------------------
BETA = 1.2        # ProxyCLIP beta
GAMMA = 3.0       # ProxyCLIP gamma
PATCH = 4         # stands in for CLIP/DINO patch size
D_VFM = 128       # VFM (DINO) feature dim
D_CLIP = 128      # CLIP transformer width
D_EMB = 128       # CLIP visual output embedding dim
LN_EPS = 1e-5
VMEM_LIMIT = 32 * 1024 * 1024   # safe on v5e/v6e/v7x (item 5 of review)


def _pick_tile(n: int, ladder) -> int:
    """Largest tile in a lane/sublane-friendly ladder that divides n."""
    for t in ladder:
        if n >= t and n % t == 0:
            return t
    return n  # block equals full dim (always legal)


# ------------------------ stage 1: fused projections -------------------------
def project_kernel(x_ref, w_ref, b_ref, vfm_ref, v_ref, cs_ref):
    # x: (tm, P) bf16, w: (P, D_VFM + D_CLIP) bf16 -> one MXU pass (K padded by Mosaic)
    y = jnp.dot(x_ref[...], w_ref[...], preferred_element_type=jnp.float32)
    y = y + b_ref[...]                           # (tm, D_VFM + D_CLIP) f32
    vfm_raw = y[:, :D_VFM]
    val = y[:, D_VFM:]
    # F.normalize(dim=-1) on the VFM features (f32 math, bf16 storage)
    inv = jax.lax.rsqrt(jnp.sum(vfm_raw * vfm_raw, axis=-1, keepdims=True) + 1e-12)
    vfm_n = vfm_raw * inv
    vfm_ref[...] = vfm_n.astype(vfm_ref.dtype)
    v_ref[...] = val.astype(v_ref.dtype)
    # per-tile column sums of the normalized features -> mean(sim) without an
    # extra HBM pass over vfm in the wrapper
    cs_ref[...] = jnp.sum(vfm_n, axis=0, keepdims=True)


# ----------------------------- wrapper ---------------------------------------
@jax.jit
def proxyclip_forward(img, params):
    """img: (B, 3, H, W) NCHW float32.  Returns {'x_norm_patchtokens': (B,N,D_EMB)}."""
    B, C, H, W = img.shape
    p = PATCH
    I, J = H // p, W // p
    N = I * J
    P = C * p * p

    # unfold NCHW image into non-overlapping patches -> (B*N, C*p*p), no padding
    x = img.reshape(B, C, I, p, J, p)
    x = x.transpose(0, 2, 4, 1, 3, 5).reshape(B, N, P)
    x_flat = x.reshape(B * N, P).astype(jnp.bfloat16)   # batch folded into M

    (w_vfm, w_clip, b_clip, w_v, b_v, w_out, b_out, ln_g, ln_b, w_proj) = params

    # host-side fusion: CLIP token proj folded into value proj; concat with vfm proj
    w_cv = w_clip @ w_v                                        # (P, D_CLIP)
    b_cv = b_clip @ w_v + b_v                                  # (1, D_CLIP)
    w_cat = jnp.concatenate([w_vfm, w_cv], axis=1).astype(jnp.bfloat16)   # (P, D_CAT)
    b_cat = jnp.concatenate(
        [jnp.zeros((1, D_VFM), jnp.float32), b_cv.astype(jnp.float32)], axis=1)

    D_CAT = D_VFM + D_CLIP
    M = B * N
    # tm divides N so no stage-1 tile ever spans two images (per-image col sums)
    tm = _pick_tile(N, (512, 256, 128, 64, 32, 16, 8))
    G = M // tm

    vfm_flat, v_flat, cs_part = pl.pallas_call(
        project_kernel,
        out_shape=(jax.ShapeDtypeStruct((M, D_VFM), jnp.bfloat16),
                   jax.ShapeDtypeStruct((M, D_CLIP), jnp.bfloat16),
                   jax.ShapeDtypeStruct((G, 1, D_VFM), jnp.float32)),
        grid=(G,),
        in_specs=[
            pl.BlockSpec((tm, P), lambda i: (i, 0)),
            pl.BlockSpec((P, D_CAT), lambda i: (0, 0)),
            pl.BlockSpec((1, D_CAT), lambda i: (0, 0)),
        ],
        out_specs=(pl.BlockSpec((tm, D_VFM), lambda i: (i, 0)),
                   pl.BlockSpec((tm, D_CLIP), lambda i: (i, 0)),
                   pl.BlockSpec((None, 1, D_VFM), lambda i: (i, 0, 0))),
        compiler_params=pltpu.CompilerParams(
            dimension_semantics=("parallel",),
            vmem_limit_bytes=VMEM_LIMIT),
    )(x_flat, w_cat, b_cat)

    vfm = vfm_flat.reshape(B, N, D_VFM)
    v_tok = v_flat.reshape(B, N, D_CLIP)

    # per-image mean(sim) computed algebraically from per-image vfm column sums:
    # mean_b = || sum_i vfm_i^b ||^2 / N^2   (== jnp.mean(vfm_b @ vfm_b.T))
    col_sum = cs_part.reshape(B, N // tm, D_VFM).sum(axis=1)        # (B, D_VFM)
    mean_sim = jnp.sum(col_sum * col_sum, axis=-1) / jnp.float32(N * N)
    thresh = (BETA * mean_sim).astype(jnp.float32)                  # (B,) SMEM

    tq = _pick_tile(N, (2048, 1024, 512, 256, 128, 64, 32, 16, 8))
    tk = _pick_tile(N, (512, 256, 128, 64, 32, 16, 8))
    nk = N // tk

    # -------- stage 2: proxy attention (K/V VMEM-resident per image) --------
    def proxy_attn_kernel(thresh_ref, q_ref, k_ref, v_ref,
                          w_out_ref, b_out_ref, ln_g_ref, ln_b_ref, w_proj_ref,
                          o_ref):
        b = pl.program_id(0)
        thresh_b = thresh_ref[b]                     # per-image beta * mean(sim)
        # vfm rows are unit-norm => sim <= 1 => (sim - thresh) * gamma <= cap.
        cap = (1.0 - thresh_b) * GAMMA               # fixed softmax max

        q = q_ref[...]                               # (tq, D_VFM) bf16

        def body(j, carry):
            acc, l = carry
            off = pl.multiple_of(j * tk, tk)
            k = k_ref[pl.ds(off, tk), :]             # (tk, D_VFM)  bf16
            v = v_ref[pl.ds(off, tk), :]             # (tk, D_CLIP) bf16
            # contraction on last dims of both operands: no k transpose
            s = jax.lax.dot_general(q, k, (((1,), (1,)), ((), ())),
                                    preferred_element_type=jnp.float32)  # (tq, tk)
            s = (s - thresh_b) * GAMMA
            # masked entries contribute exactly 0; no -inf / running-max needed
            p_blk = jnp.where(s < 0.0, 0.0, jnp.exp(s - cap))
            l = l + jnp.sum(p_blk, axis=-1, keepdims=True)
            acc = acc + jnp.dot(p_blk.astype(jnp.bfloat16), v,
                                preferred_element_type=jnp.float32)
            return acc, l

        acc0 = jnp.zeros((tq, D_CLIP), jnp.float32)
        l0 = jnp.zeros((tq, 1), jnp.float32)
        acc, l = jax.lax.fori_loop(0, nk, body, (acc0, l0), unroll=(nk <= 4))

        # guard against a fully-masked row (degenerate thresh >= 1)
        l = jnp.where(l > 0.0, l, 1.0)
        attn_out = acc * pl.reciprocal(l)            # exact: once per q-tile

        # out_proj of the last attention block
        out = jnp.dot(attn_out.astype(jnp.bfloat16), w_out_ref[...],
                      preferred_element_type=jnp.float32) + b_out_ref[...]
        # ln_post
        mu = jnp.mean(out, axis=-1, keepdims=True)
        var = jnp.mean((out - mu) ** 2, axis=-1, keepdims=True)
        out = (out - mu) * jax.lax.rsqrt(var + LN_EPS) * ln_g_ref[...] + ln_b_ref[...]
        # visual projection + final L2 normalization (image_features /= norm)
        feat = jnp.dot(out.astype(jnp.bfloat16), w_proj_ref[...],
                       preferred_element_type=jnp.float32)              # (tq, De)
        feat = feat * jax.lax.rsqrt(jnp.sum(feat * feat, axis=-1, keepdims=True) + 1e-12)
        o_ref[...] = feat.astype(o_ref.dtype)

    out = pl.pallas_call(
        proxy_attn_kernel,
        out_shape=jax.ShapeDtypeStruct((B, N, D_EMB), jnp.float32),
        grid=(B, N // tq),
        in_specs=[
            pl.BlockSpec(memory_space=pltpu.MemorySpace.SMEM),              # thresh (B,)
            pl.BlockSpec((None, tq, D_VFM), lambda b, qi: (b, qi, 0)),      # vfm (query tile)
            pl.BlockSpec((None, N, D_VFM), lambda b, qi: (b, 0, 0)),        # vfm (full keys, resident)
            pl.BlockSpec((None, N, D_CLIP), lambda b, qi: (b, 0, 0)),       # value tokens (resident)
            pl.BlockSpec((D_CLIP, D_CLIP), lambda b, qi: (0, 0)),           # w_out
            pl.BlockSpec((1, D_CLIP), lambda b, qi: (0, 0)),                # b_out
            pl.BlockSpec((1, D_CLIP), lambda b, qi: (0, 0)),                # ln_g
            pl.BlockSpec((1, D_CLIP), lambda b, qi: (0, 0)),                # ln_b
            pl.BlockSpec((D_CLIP, D_EMB), lambda b, qi: (0, 0)),            # w_proj
        ],
        out_specs=pl.BlockSpec((None, tq, D_EMB), lambda b, qi: (b, qi, 0)),
        compiler_params=pltpu.CompilerParams(
            dimension_semantics=("parallel", "parallel"),
            vmem_limit_bytes=VMEM_LIMIT),
    )(thresh, vfm, vfm, v_tok, w_out.astype(jnp.bfloat16), b_out,
      ln_g, ln_b, w_proj.astype(jnp.bfloat16))

    return {'x_norm_patchtokens': out}


def init_params(key, P):
    ks = jax.random.split(key, 8)
    std = 0.02
    w_vfm = jax.random.normal(ks[0], (P, D_VFM), jnp.float32) * std
    w_clip = jax.random.normal(ks[1], (P, D_CLIP), jnp.float32) * std
    b_clip = jax.random.normal(ks[2], (1, D_CLIP), jnp.float32) * std
    w_v = jax.random.normal(ks[3], (D_CLIP, D_CLIP), jnp.float32) * std
    b_v = jax.random.normal(ks[4], (1, D_CLIP), jnp.float32) * std
    w_out = jax.random.normal(ks[5], (D_CLIP, D_CLIP), jnp.float32) * std
    b_out = jax.random.normal(ks[6], (1, D_CLIP), jnp.float32) * std
    ln_g = jnp.ones((1, D_CLIP), jnp.float32)
    ln_b = jnp.zeros((1, D_CLIP), jnp.float32)
    w_proj = jax.random.normal(ks[7], (D_CLIP, D_EMB), jnp.float32) * std
    return (w_vfm, w_clip, b_clip, w_v, b_v, w_out, b_out, ln_g, ln_b, w_proj)


if __name__ == "__main__":
    key = jax.random.PRNGKey(0)
    k_img, k_par = jax.random.split(key)

    B, C, H, W = 2, 3, 32, 32                      # small image, 8x8 = 64 patches
    img = jax.random.normal(k_img, (B, C, H, W), jnp.float32)
    params = init_params(k_par, C * PATCH * PATCH)

    out = proxyclip_forward(img, params)
    feats = jax.block_until_ready(out['x_norm_patchtokens'])

    # sanity: shape and unit-norm rows
    assert feats.shape == (B, (H // PATCH) * (W // PATCH), D_EMB)
    norms = jnp.sqrt(jnp.sum(feats * feats, axis=-1))
    assert bool(jnp.all(jnp.isfinite(feats)))
    assert bool(jnp.all(jnp.abs(norms - 1.0) < 1e-3))

    print("KERNEL_OK")
</pallas_src>

<mosaic_0001>
module attributes {stable_mosaic.version = 11 : i64} {
  func.func @project_kernel(%arg0: i32, %arg1: memref<64x48xbf16, #tpu.memory_space<vmem>>, %arg2: memref<48x256xbf16, #tpu.memory_space<vmem>>, %arg3: memref<1x256xf32, #tpu.memory_space<vmem>>, %arg4: memref<64x128xbf16, #tpu.memory_space<vmem>>, %arg5: memref<64x128xbf16, #tpu.memory_space<vmem>>, %arg6: memref<1x1x128xf32, #tpu.memory_space<vmem>>) attributes {dimension_semantics = [#tpu.dimension_semantics<parallel>], iteration_bounds = array<i64: 2>, scalar_prefetch = 0 : i64, scratch_operands = 0 : i64, tpu.core_type = #tpu.core_type<tc>, window_params = [{transform_indices = @transform_0, window_bounds = array<i64: 64, 48>}, {pipeline_mode = #tpu.pipeline_mode<synchronous>, transform_indices = @transform_1, window_bounds = array<i64: 48, 256>}, {pipeline_mode = #tpu.pipeline_mode<synchronous>, transform_indices = @transform_2, window_bounds = array<i64: 1, 256>}, {transform_indices = @transform_3, window_bounds = array<i64: 64, 128>}, {transform_indices = @transform_4, window_bounds = array<i64: 64, 128>}, {transform_indices = @transform_5, window_bounds = array<i64: 1, 1, 128>}]} {
    %c0 = arith.constant 0 : index
    %c0_0 = arith.constant 0 : index
    %0 = vector.load %arg1[%c0, %c0_0] : memref<64x48xbf16, #tpu.memory_space<vmem>>, vector<64x48xbf16>
    %c0_1 = arith.constant 0 : index
    %c0_2 = arith.constant 0 : index
    %1 = vector.load %arg2[%c0_1, %c0_2] : memref<48x256xbf16, #tpu.memory_space<vmem>>, vector<48x256xbf16>
    %cst = arith.constant dense<0.000000e+00> : vector<64x256xf32>
    %2 = tpu.matmul %0, %1, %cst {dimension_numbers = #tpu.dot_dimension_numbers<[1], [0], [0], [1], [0, 0, 1, 1], [], []>} : vector<64x48xbf16>, vector<48x256xbf16>, vector<64x256xf32> -> vector<64x256xf32>
    %c0_3 = arith.constant 0 : index
    %c0_4 = arith.constant 0 : index
    %3 = vector.load %arg3[%c0_3, %c0_4] : memref<1x256xf32, #tpu.memory_space<vmem>>, vector<1x256xf32>
    %4 = vector.broadcast %3 : vector<1x256xf32> to vector<64x256xf32>
    %5 = arith.addf %2, %4 : vector<64x256xf32>
    %6 = vector.extract_strided_slice %5 {offsets = [0, 0], sizes = [64, 128], strides = [1, 1]} : vector<64x256xf32> to vector<64x128xf32>
    %7 = vector.extract_strided_slice %5 {offsets = [0, 128], sizes = [64, 128], strides = [1, 1]} : vector<64x256xf32> to vector<64x128xf32>
    %8 = arith.mulf %6, %6 : vector<64x128xf32>
    %cst_5 = arith.constant dense<0.000000e+00> : vector<64xf32>
    %9 = vector.multi_reduction <add>, %8, %cst_5 [1] : vector<64x128xf32> to vector<64xf32>
    %10 = vector.shape_cast %9 : vector<64xf32> to vector<64x1xf32>
    %cst_6 = arith.constant 9.99999996E-13 : f32
    %11 = vector.broadcast %cst_6 : f32 to vector<64x1xf32>
    %12 = arith.addf %10, %11 : vector<64x1xf32>
    %13 = math.rsqrt %12 : vector<64x1xf32>
    %14 = vector.broadcast %13 : vector<64x1xf32> to vector<64x128xf32>
    %15 = arith.mulf %6, %14 : vector<64x128xf32>
    %16 = arith.truncf %15 : vector<64x128xf32> to vector<64x128xbf16>
    %c0_7 = arith.constant 0 : index
    %c0_8 = arith.constant 0 : index
    %17 = vector.load %arg4[%c0_7, %c0_8] : memref<64x128xbf16, #tpu.memory_space<vmem>>, vector<64x128xbf16>
    tpu.vector_store %arg4[%c0_7, %c0_8], %16 {strides = array<i32>} : memref<64x128xbf16, #tpu.memory_space<vmem>>, vector<64x128xbf16>,
    %18 = arith.truncf %7 : vector<64x128xf32> to vector<64x128xbf16>
    %c0_9 = arith.constant 0 : index
    %c0_10 = arith.constant 0 : index
    %19 = vector.load %arg5[%c0_9, %c0_10] : memref<64x128xbf16, #tpu.memory_space<vmem>>, vector<64x128xbf16>
    tpu.vector_store %arg5[%c0_9, %c0_10], %18 {strides = array<i32>} : memref<64x128xbf16, #tpu.memory_space<vmem>>, vector<64x128xbf16>,
    %cst_11 = arith.constant dense<0.000000e+00> : vector<128xf32>
    %20 = vector.multi_reduction <add>, %15, %cst_11 [0] : vector<64x128xf32> to vector<128xf32>
    %21 = vector.shape_cast %20 : vector<128xf32> to vector<1x128xf32>
    %c0_12 = arith.constant 0 : index
    %c0_13 = arith.constant 0 : index
    %c0_14 = arith.constant 0 : index
    %22 = vector.load %arg6[%c0_12, %c0_13, %c0_14] : memref<1x1x128xf32, #tpu.memory_space<vmem>>, vector<1x1x128xf32>
    %23 = vector.shape_cast %22 : vector<1x1x128xf32> to vector<1x128xf32>
    %24 = vector.shape_cast %21 : vector<1x128xf32> to vector<1x1x128xf32>
    tpu.vector_store %arg6[%c0_12, %c0_13, %c0_14], %24 {strides = array<i32>} : memref<1x1x128xf32, #tpu.memory_space<vmem>>, vector<1x1x128xf32>,
    return
  }
  func.func @transform_0(%arg0: i32) -> (i32, i32) {
    %c0_i32 = arith.constant 0 : i32
    %c0_i32_0 = arith.constant 0 : i32
    return %arg0, %c0_i32 : i32, i32
  }
  func.func @transform_1(%arg0: i32) -> (i32, i32) {
    %c0_i32 = arith.constant 0 : i32
    %c0_i32_0 = arith.constant 0 : i32
    %c0_i32_1 = arith.constant 0 : i32
    return %c0_i32, %c0_i32_0 : i32, i32
  }
  func.func @transform_2(%arg0: i32) -> (i32, i32) {
    %c0_i32 = arith.constant 0 : i32
    %c0_i32_0 = arith.constant 0 : i32
    %c0_i32_1 = arith.constant 0 : i32
    return %c0_i32, %c0_i32_0 : i32, i32
  }
  func.func @transform_3(%arg0: i32) -> (i32, i32) {
    %c0_i32 = arith.constant 0 : i32
    %c0_i32_0 = arith.constant 0 : i32
    return %arg0, %c0_i32 : i32, i32
  }
  func.func @transform_4(%arg0: i32) -> (i32, i32) {
    %c0_i32 = arith.constant 0 : i32
    %c0_i32_0 = arith.constant 0 : i32
    return %arg0, %c0_i32 : i32, i32
  }
  func.func @transform_5(%arg0: i32) -> (i32, i32, i32) {
    %c0_i32 = arith.constant 0 : i32
    %c0_i32_0 = arith.constant 0 : i32
    %c0_i32_1 = arith.constant 0 : i32
    return %arg0, %c0_i32, %c0_i32_0 : i32, i32, i32
  }
}

module attributes {stable_mosaic.version = 11 : i64} {
  func.func @proxy_attn_kernel(%arg0: i32, %arg1: i32, %arg2: memref<2xf32, #tpu.memory_space<smem>>, %arg3: memref<1x64x128xbf16, #tpu.memory_space<vmem>>, %arg4: memref<1x64x128xbf16, #tpu.memory_space<vmem>>, %arg5: memref<1x64x128xbf16, #tpu.memory_space<vmem>>, %arg6: memref<128x128xbf16, #tpu.memory_space<vmem>>, %arg7: memref<1x128xf32, #tpu.memory_space<vmem>>, %arg8: memref<1x128xf32, #tpu.memory_space<vmem>>, %arg9: memref<1x128xf32, #tpu.memory_space<vmem>>, %arg10: memref<128x128xbf16, #tpu.memory_space<vmem>>, %arg11: memref<1x64x128xf32, #tpu.memory_space<vmem>>) attributes {dimension_semantics = [#tpu.dimension_semantics<parallel>, #tpu.dimension_semantics<parallel>], iteration_bounds = array<i64: 2, 1>, scalar_prefetch = 0 : i64, scratch_operands = 0 : i64, tpu.core_type = #tpu.core_type<tc>, window_params = [{transform_indices = @transform_0, window_bounds = array<i64: 2>}, {transform_indices = @transform_1, window_bounds = array<i64: 1, 64, 128>}, {transform_indices = @transform_2, window_bounds = array<i64: 1, 64, 128>}, {transform_indices = @transform_3, window_bounds = array<i64: 1, 64, 128>}, {pipeline_mode = #tpu.pipeline_mode<synchronous>, transform_indices = @transform_4, window_bounds = array<i64: 128, 128>}, {pipeline_mode = #tpu.pipeline_mode<synchronous>, transform_indices = @transform_5, window_bounds = array<i64: 1, 128>}, {pipeline_mode = #tpu.pipeline_mode<synchronous>, transform_indices = @transform_6, window_bounds = array<i64: 1, 128>}, {pipeline_mode = #tpu.pipeline_mode<synchronous>, transform_indices = @transform_7, window_bounds = array<i64: 1, 128>}, {pipeline_mode = #tpu.pipeline_mode<synchronous>, transform_indices = @transform_8, window_bounds = array<i64: 128, 128>}, {transform_indices = @transform_9, window_bounds = array<i64: 1, 64, 128>}]} {
    %0 = arith.index_cast %arg0 : i32 to index
    %1 = memref.load %arg2[%0] : memref<2xf32, #tpu.memory_space<smem>>
    %cst = arith.constant 1.000000e+00 : f32
    %2 = arith.subf %cst, %1 : f32
    %cst_0 = arith.constant 3.000000e+00 : f32
    %3 = arith.mulf %2, %cst_0 : f32
    %c0 = arith.constant 0 : index
    %c0_1 = arith.constant 0 : index
    %c0_2 = arith.constant 0 : index
    %4 = vector.load %arg3[%c0, %c0_1, %c0_2] : memref<1x64x128xbf16, #tpu.memory_space<vmem>>, vector<1x64x128xbf16>
    %5 = vector.shape_cast %4 : vector<1x64x128xbf16> to vector<64x128xbf16>
    %cst_3 = arith.constant 0.000000e+00 : f32
    %6 = vector.broadcast %cst_3 : f32 to vector<64x128xf32>
    %cst_4 = arith.constant 0.000000e+00 : f32
    %7 = vector.broadcast %cst_4 : f32 to vector<64x1xf32>
    %c0_i32 = arith.constant 0 : i32
    %c64_i32 = arith.constant 64 : i32
    %8 = arith.muli %c0_i32, %c64_i32 : i32
    %9 = tpu.assume_multiple %8, 64 : i32
    %c0_5 = arith.constant 0 : index
    %10 = arith.index_cast %9 : i32 to index
    %c0_6 = arith.constant 0 : index
    %11 = vector.load %arg4[%c0_5, %10, %c0_6] : memref<1x64x128xbf16, #tpu.memory_space<vmem>>, vector<1x64x128xbf16>
    %12 = vector.shape_cast %11 : vector<1x64x128xbf16> to vector<64x128xbf16>
    %c0_7 = arith.constant 0 : index
    %13 = arith.index_cast %9 : i32 to index
    %c0_8 = arith.constant 0 : index
    %14 = vector.load %arg5[%c0_7, %13, %c0_8] : memref<1x64x128xbf16, #tpu.memory_space<vmem>>, vector<1x64x128xbf16>
    %15 = vector.shape_cast %14 : vector<1x64x128xbf16> to vector<64x128xbf16>
    %cst_9 = arith.constant dense<0.000000e+00> : vector<64x64xf32>
    %16 = tpu.matmul %5, %12, %cst_9 {dimension_numbers = #tpu.dot_dimension_numbers<[1], [1], [0], [0], [0, 0, 1, 0], [], []>} : vector<64x128xbf16>, vector<64x128xbf16>, vector<64x64xf32> -> vector<64x64xf32>
    %17 = vector.broadcast %1 : f32 to vector<64x64xf32>
    %18 = arith.subf %16, %17 : vector<64x64xf32>
    %cst_10 = arith.constant 3.000000e+00 : f32
    %19 = vector.broadcast %cst_10 : f32 to vector<64x64xf32>
    %20 = arith.mulf %18, %19 : vector<64x64xf32>
    %cst_11 = arith.constant 0.000000e+00 : f32
    %21 = vector.broadcast %cst_11 : f32 to vector<64x64xf32>
    %22 = arith.cmpf olt, %20, %21 : vector<64x64xf32>
    %23 = vector.broadcast %3 : f32 to vector<64x64xf32>
    %24 = arith.subf %20, %23 : vector<64x64xf32>
    %25 = math.exp %24 : vector<64x64xf32>
    %cst_12 = arith.constant 0.000000e+00 : f32
    %26 = vector.broadcast %cst_12 : f32 to vector<64x64xf32>
    %27 = arith.select %22, %26, %25 : vector<64x64xi1>, vector<64x64xf32>
    %cst_13 = arith.constant dense<0.000000e+00> : vector<64xf32>
    %28 = vector.multi_reduction <add>, %27, %cst_13 [1] : vector<64x64xf32> to vector<64xf32>
    %29 = vector.shape_cast %28 : vector<64xf32> to vector<64x1xf32>
    %30 = arith.addf %7, %29 : vector<64x1xf32>
    %31 = arith.truncf %27 : vector<64x64xf32> to vector<64x64xbf16>
    %cst_14 = arith.constant dense<0.000000e+00> : vector<64x128xf32>
    %32 = tpu.matmul %31, %15, %cst_14 {dimension_numbers = #tpu.dot_dimension_numbers<[1], [0], [0], [1], [0, 0, 1, 1], [], []>} : vector<64x64xbf16>, vector<64x128xbf16>, vector<64x128xf32> -> vector<64x128xf32>
    %33 = arith.addf %6, %32 : vector<64x128xf32>
    %c1_i32 = arith.constant 1 : i32
    %cst_15 = arith.constant 0.000000e+00 : f32
    %34 = vector.broadcast %cst_15 : f32 to vector<64x1xf32>
    %35 = arith.cmpf ogt, %30, %34 : vector<64x1xf32>
    %cst_16 = arith.constant 1.000000e+00 : f32
    %36 = vector.broadcast %cst_16 : f32 to vector<64x1xf32>
    %37 = arith.select %35, %30, %36 : vector<64x1xi1>, vector<64x1xf32>
    %38 = tpu.reciprocal %37 : vector<64x1xf32> -> vector<64x1xf32>
    %39 = vector.broadcast %38 : vector<64x1xf32> to vector<64x128xf32>
    %40 = arith.mulf %33, %39 : vector<64x128xf32>
    %41 = arith.truncf %40 : vector<64x128xf32> to vector<64x128xbf16>
    %c0_17 = arith.constant 0 : index
    %c0_18 = arith.constant 0 : index
    %42 = vector.load %arg6[%c0_17, %c0_18] : memref<128x128xbf16, #tpu.memory_space<vmem>>, vector<128x128xbf16>
    %cst_19 = arith.constant dense<0.000000e+00> : vector<64x128xf32>
    %43 = tpu.matmul %41, %42, %cst_19 {dimension_numbers = #tpu.dot_dimension_numbers<[1], [0], [0], [1], [0, 0, 1, 1], [], []>} : vector<64x128xbf16>, vector<128x128xbf16>, vector<64x128xf32> -> vector<64x128xf32>
    %c0_20 = arith.constant 0 : index
    %c0_21 = arith.constant 0 : index
    %44 = vector.load %arg7[%c0_20, %c0_21] : memref<1x128xf32, #tpu.memory_space<vmem>>, vector<1x128xf32>
    %45 = vector.broadcast %44 : vector<1x128xf32> to vector<64x128xf32>
    %46 = arith.addf %43, %45 : vector<64x128xf32>
    %cst_22 = arith.constant dense<0.000000e+00> : vector<64xf32>
    %47 = vector.multi_reduction <add>, %46, %cst_22 [1] : vector<64x128xf32> to vector<64xf32>
    %48 = vector.shape_cast %47 : vector<64xf32> to vector<64x1xf32>
    %cst_23 = arith.constant 1.280000e+02 : f32
    %49 = vector.broadcast %cst_23 : f32 to vector<64x1xf32>
    %50 = arith.divf %48, %49 : vector<64x1xf32>
    %51 = vector.broadcast %50 : vector<64x1xf32> to vector<64x128xf32>
    %52 = arith.subf %46, %51 : vector<64x128xf32>
    %53 = arith.mulf %52, %52 : vector<64x128xf32>
    %cst_24 = arith.constant dense<0.000000e+00> : vector<64xf32>
    %54 = vector.multi_reduction <add>, %53, %cst_24 [1] : vector<64x128xf32> to vector<64xf32>
    %55 = vector.shape_cast %54 : vector<64xf32> to vector<64x1xf32>
    %cst_25 = arith.constant 1.280000e+02 : f32
    %56 = vector.broadcast %cst_25 : f32 to vector<64x1xf32>
    %57 = arith.divf %55, %56 : vector<64x1xf32>
    %58 = vector.broadcast %50 : vector<64x1xf32> to vector<64x128xf32>
    %59 = arith.subf %46, %58 : vector<64x128xf32>
    %cst_26 = arith.constant 9.99999974E-6 : f32
    %60 = vector.broadcast %cst_26 : f32 to vector<64x1xf32>
    %61 = arith.addf %57, %60 : vector<64x1xf32>
    %62 = math.rsqrt %61 : vector<64x1xf32>
    %63 = vector.broadcast %62 : vector<64x1xf32> to vector<64x128xf32>
    %64 = arith.mulf %59, %63 : vector<64x128xf32>
    %c0_27 = arith.constant 0 : index
    %c0_28 = arith.constant 0 : index
    %65 = vector.load %arg8[%c0_27, %c0_28] : memref<1x128xf32, #tpu.memory_space<vmem>>, vector<1x128xf32>
    %66 = vector.broadcast %65 : vector<1x128xf32> to vector<64x128xf32>
    %67 = arith.mulf %64, %66 : vector<64x128xf32>
    %c0_29 = arith.constant 0 : index
    %c0_30 = arith.constant 0 : index
    %68 = vector.load %arg9[%c0_29, %c0_30] : memref<1x128xf32, #tpu.memory_space<vmem>>, vector<1x128xf32>
    %69 = vector.broadcast %68 : vector<1x128xf32> to vector<64x128xf32>
    %70 = arith.addf %67, %69 : vector<64x128xf32>
    %71 = arith.truncf %70 : vector<64x128xf32> to vector<64x128xbf16>
    %c0_31 = arith.constant 0 : index
    %c0_32 = arith.constant 0 : index
    %72 = vector.load %arg10[%c0_31, %c0_32] : memref<128x128xbf16, #tpu.memory_space<vmem>>, vector<128x128xbf16>
    %cst_33 = arith.constant dense<0.000000e+00> : vector<64x128xf32>
    %73 = tpu.matmul %71, %72, %cst_33 {dimension_numbers = #tpu.dot_dimension_numbers<[1], [0], [0], [1], [0, 0, 1, 1], [], []>} : vector<64x128xbf16>, vector<128x128xbf16>, vector<64x128xf32> -> vector<64x128xf32>
    %74 = arith.mulf %73, %73 : vector<64x128xf32>
    %cst_34 = arith.constant dense<0.000000e+00> : vector<64xf32>
    %75 = vector.multi_reduction <add>, %74, %cst_34 [1] : vector<64x128xf32> to vector<64xf32>
    %76 = vector.shape_cast %75 : vector<64xf32> to vector<64x1xf32>
    %cst_35 = arith.constant 9.99999996E-13 : f32
    %77 = vector.broadcast %cst_35 : f32 to vector<64x1xf32>
    %78 = arith.addf %76, %77 : vector<64x1xf32>
    %79 = math.rsqrt %78 : vector<64x1xf32>
    %80 = vector.broadcast %79 : vector<64x1xf32> to vector<64x128xf32>
    %81 = arith.mulf %73, %80 : vector<64x128xf32>
    %c0_36 = arith.constant 0 : index
    %c0_37 = arith.constant 0 : index
    %c0_38 = arith.constant 0 : index
    %82 = vector.load %arg11[%c0_36, %c0_37, %c0_38] : memref<1x64x128xf32, #tpu.memory_space<vmem>>, vector<1x64x128xf32>
    %83 = vector.shape_cast %82 : vector<1x64x128xf32> to vector<64x128xf32>
    %84 = vector.shape_cast %81 : vector<64x128xf32> to vector<1x64x128xf32>
    tpu.vector_store %arg11[%c0_36, %c0_37, %c0_38], %84 {strides = array<i32>} : memref<1x64x128xf32, #tpu.memory_space<vmem>>, vector<1x64x128xf32>,
    return
  }
  func.func @transform_0(%arg0: i32, %arg1: i32) -> i32 {
    %c0_i32 = arith.constant 0 : i32
    %c0_i32_0 = arith.constant 0 : i32
    return %c0_i32 : i32
  }
  func.func @transform_1(%arg0: i32, %arg1: i32) -> (i32, i32, i32) {
    %c0_i32 = arith.constant 0 : i32
    %c0_i32_0 = arith.constant 0 : i32
    return %arg0, %arg1, %c0_i32 : i32, i32, i32
  }
  func.func @transform_2(%arg0: i32, %arg1: i32) -> (i32, i32, i32) {
    %c0_i32 = arith.constant 0 : i32
    %c0_i32_0 = arith.constant 0 : i32
    %c0_i32_1 = arith.constant 0 : i32
    return %arg0, %c0_i32, %c0_i32_0 : i32, i32, i32
  }
  func.func @transform_3(%arg0: i32, %arg1: i32) -> (i32, i32, i32) {
    %c0_i32 = arith.constant 0 : i32
    %c0_i32_0 = arith.constant 0 : i32
    %c0_i32_1 = arith.constant 0 : i32
    return %arg0, %c0_i32, %c0_i32_0 : i32, i32, i32
  }
  func.func @transform_4(%arg0: i32, %arg1: i32) -> (i32, i32) {
    %c0_i32 = arith.constant 0 : i32
    %c0_i32_0 = arith.constant 0 : i32
    %c0_i32_1 = arith.constant 0 : i32
    return %c0_i32, %c0_i32_0 : i32, i32
  }
  func.func @transform_5(%arg0: i32, %arg1: i32) -> (i32, i32) {
    %c0_i32 = arith.constant 0 : i32
    %c0_i32_0 = arith.constant 0 : i32
    %c0_i32_1 = arith.constant 0 : i32
    return %c0_i32, %c0_i32_0 : i32, i32
  }
  func.func @transform_6(%arg0: i32, %arg1: i32) -> (i32, i32) {
    %c0_i32 = arith.constant 0 : i32
    %c0_i32_0 = arith.constant 0 : i32
    %c0_i32_1 = arith.constant 0 : i32
    return %c0_i32, %c0_i32_0 : i32, i32
  }
  func.func @transform_7(%arg0: i32, %arg1: i32) -> (i32, i32) {
    %c0_i32 = arith.constant 0 : i32
    %c0_i32_0 = arith.constant 0 : i32
    %c0_i32_1 = arith.constant 0 : i32
    return %c0_i32, %c0_i32_0 : i32, i32
  }
  func.func @transform_8(%arg0: i32, %arg1: i32) -> (i32, i32) {
    %c0_i32 = arith.constant 0 : i32
    %c0_i32_0 = arith.constant 0 : i32
    %c0_i32_1 = arith.constant 0 : i32
    return %c0_i32, %c0_i32_0 : i32, i32
  }
  func.func @transform_9(%arg0: i32, %arg1: i32) -> (i32, i32, i32) {
    %c0_i32 = arith.constant 0 : i32
    %c0_i32_0 = arith.constant 0 : i32
    return %arg0, %arg1, %c0_i32 : i32, i32, i32
  }
}

</mosaic_0001>

<bundles_post_ra>
// kernel: proxyclip_forward.2
= control target key start
LH: loop header
LB: loop body
LE: loop exit
PB: predicated region body
PF: predicated region fallthrough
CT: control target
= control target key end

     0   :  { %s858_s18 = smov 0   ;;  %s1057_s0 = inlined_call_operand.vmem [shape: bf16[128,48], index: 0, kind: input, shape index: {}]   ;;  %s1058_s1 = inlined_call_operand.vmem [shape: bf16[48,256], index: 1, kind: input, shape index: {}]   ;;  %s1059_s2 = inlined_call_operand.vmem [shape: f32[1,256], index: 2, kind: input, shape index: {}]   ;;  %s1060_s3 = inlined_call_operand.vmem [shape: bf16[128,128], index: 3, kind: output, shape index: {0}]   ;;  %s1061_s4 = inlined_call_operand.vmem [shape: bf16[128,128], index: 4, kind: output, shape index: {1}]   ;;  %s1062_s5 = inlined_call_operand.vmem [shape: f32[2,1,128], index: 5, kind: output, shape index: {2}]  }
   0x1 LB: > { %s864_s19 = sadd.s32 4294967295, %s826_s18   ;;  %p677_p0 = scmp.ge.s32.totalorder %s826_s18, 1  ;;  %s826_s18 = sphi %s858_s18, %s16_s18  }
   0x2   : > { %p193_p1 = scmp.lt.s32.totalorder %s826_s18, 3 }
   0x4   : > { %p194_p2 = pnand %p677_p0, %p193_p1 }
   0x5   : > { %s678_s28 = sshll.u32 (!%p194_p2), %s864_s19, 3  ;;  %p247_p4 = scmp.lt.s32.totalorder (!%p194_p2), %s864_s19, 1 }
   0x6   : > { %197 = sbr.rel (%p194_p2) target bundleno = 340 (0x154), region = 32  ;;  %p230_p3 = scmp.lt.s32.totalorder (!%p194_p2), %s678_s28, 15 }
   0xb   : > { %v718_v0 = vld [vmem:[%s1058_s1 + $0x20] sm:$0xf]  ;;  %v743_v1 = vld [vmem:[%s1058_s1 + $0x24] sm:$0xf0]  ;;  %v710_v2 = vld [vmem:[%s1058_s1 + $0x10] sm:$0xf] }
   0xc   : > { %v719_v3 = vor.u32 %v743_v1, %v718_v0  ;;  %v741_v4 = vld [vmem:[%s1058_s1 + $0x14] sm:$0xf0]  ;;  %v702_v6 = vld [vmem:[%s1058_s1] sm:$0xf]  ;;  %v739_v7 = vld [vmem:[%s1058_s1 + $0x4] sm:$0xf0] }
   0xd   : > { %v711_v5 = vor.u32 %v741_v4, %v710_v2  ;;  %s1068_s28 = smov (!%p230_p3, %s678_s28), 15  ;;  %v703_v8 = vor.u32 %v739_v7, %v702_v6  ;;  %vm321_vm0 = vcmask 392192   ;;  %v742_v13 = vld [vmem:[%s1058_s1 + $0x24] sm:$0xf]  ;;  %v720_v14 = vld [vmem:[%s1058_s1 + $0x28] sm:$0xf0] }
   0xe   : > { %339 = vmatpush.bf16.msra.mxu0 %v719_v3  ;;  %790 = vmatpush.bf16.msra.mxu2 %v719_v3  ;;  %s887_s8 = sshll.u32 %s1068_s28, 2  ;;  %v723_v15 = vor.u32 %v742_v13, %v720_v14  ;;  %v740_v16 = vld [vmem:[%s1058_s1 + $0x14] sm:$0xf]  ;;  %v712_v17 = vld [vmem:[%s1058_s1 + $0x18] sm:$0xf0]  ;;  %s1070_s19 = smov (!%p247_p4, %s864_s19), 1 }
   0xf   : > { %s233_s11 = scalar_lea.vmem %s1057_s0, %s887_s8  ;;  %v715_v18 = vor.u32 %v740_v16, %v712_v17  ;;  %v738_v19 = vld [vmem:[%s1058_s1 + $0x4] sm:$0xf]  ;;  %v704_v20 = vld [vmem:[%s1058_s1 + $0x8] sm:$0xf0]  ;;  %v265_v22 = vld [vmem:[%s1059_s2] sm:$0x3]  ;;  %s967_s30 = scalar_lea.vmem %s1061_s4, %s887_s8 }
  0x10   : > { %v734_v9 = vld [vmem:[%s233_s11] sm:$0xff]  ;;  %v736_v10 = vld [vmem:[%s233_s11 + $0x10] sm:$0xff]  ;;  %v735_v11 = vld [vmem:[%s233_s11 + $0x8] sm:$0xff]  ;;  %793 = vmatpush.bf16.msra.mxu3 %v723_v15  ;;  %368 = vmatpush.bf16.msra.mxu1 %v723_v15  ;;  %v707_v21 = vor.u32 %v738_v19, %v704_v20  ;;  %v267_v23 = vperm.slane %v265_v22, 0  ;;  %v956_v55 = vperm.slane %v265_v22, 1  ;;  %s1014_s9 = scalar_lea.vmem %s1060_s3, %s887_s8 }
  0x11   : > { %v737_v12 = vld [vmem:[%s233_s11 + $0x18] sm:$0xff]  ;;  %s249_s11 = scalar_lea.vmem %s1062_s5, %s1070_s19 }
  0x12   : > { %340 = vmatpush.bf16.msra.mxu0 %v711_v5  ;;  %791 = vmatpush.bf16.msra.mxu2 %v711_v5 }
  0x14   : > { %794 = vmatpush.bf16.msra.mxu3 %v715_v18  ;;  %369 = vmatpush.bf16.msra.mxu1 %v715_v18 }
  0x16   : > { %341 = vmatpush.bf16.msra.mxu0 %v703_v8  ;;  %792 = vmatpush.bf16.msra.mxu2 %v703_v8 }
  0x18   : > { %795 = vmatpush.bf16.msra.mxu3 %v707_v21  ;;  %370 = vmatpush.bf16.msra.mxu1 %v707_v21 }
  0x19   : > { %724 = vmatmul.msk.bf16.vlgmr.msra.gmra.mxu0 %vm321_vm0, %v734_v9  ;;  %726 = vmatmul.msk.bf16.vlgmr.msra.gmra.mxu2 %vm321_vm0, %v736_v10 }
  0x1b   : > { %730 = vmatmul.msk.bf16.vlgmr.msra.gmra.mxu3 %vm321_vm0, %v736_v10  ;;  %728 = vmatmul.msk.bf16.vlgmr.msra.gmra.mxu1 %vm321_vm0, %v734_v9 }
  0x29   : > { %725 = vmatmul.msk.bf16.gmra.mxu0 %vm321_vm0, %v735_v11  ;;  %727 = vmatmul.msk.bf16.gmra.mxu2 %vm321_vm0, %v737_v12 }
  0x2b   : > { %731 = vmatmul.msk.bf16.gmra.mxu3 %vm321_vm0, %v737_v12  ;;  %729 = vmatmul.msk.bf16.gmra.mxu1 %vm321_vm0, %v735_v11 }
  0x96   : > { %v343_v24 = vpop.f32.mrf.mxu0 }
  0x97   : > { %v920_v25 = vadd.f32 %v343_v24, %v267_v23 }
  0x98   : > { %v372_v50 = vpop.f32.mrf.mxu1 }
  0x99   : > { %v392_v26 = vmul.f32 %v920_v25, %v920_v25  ;;  %v373_v61 = vadd.f32 %v372_v50, %v956_v55 }
  0x9b   : > { %400 = vadd.xlane.f32.xlu0 %v392_v26 }
  0x9c   : > { %v353_v27 = vpop.f32.mrf.mxu2 }
  0x9d   : > { %v926_v28 = vadd.f32 %v353_v27, %v267_v23 }
  0x9e   : > { %v345_v29 = vpop.f32.mrf.mxu0  ;;  %v382_v51 = vpop.f32.mrf.mxu3 }
  0x9f   : > { %v928_v30 = vadd.f32 %v345_v29, %v267_v23  ;;  %v396_v31 = vmul.f32 %v926_v28, %v926_v28  ;;  %v383_v62 = vadd.f32 %v382_v51, %v956_v55 }
  0xa0   : > { %v374_v58 = vpop.f32.mrf.mxu1 }
  0xa1   : > { %408 = vadd.xlane.f32.xlu2 %v396_v31  ;;  %v393_v32 = vmul.f32 %v928_v30, %v928_v30  ;;  %v375_v63 = vadd.f32 %v374_v58, %v956_v55 }
  0xa3   : > { %402 = vadd.xlane.f32.xlu0 %v393_v32  ;;  %v767_v2 = vpack.c.bf16 %v375_v63, %v373_v61 }
  0xa4   : > { %v355_v33 = vpop.f32.mrf.mxu2 }
  0xa5   : > { %v934_v34 = vadd.f32 %v355_v33, %v267_v23  ;;  %768 = vst [vmem:[%s967_s30] sm:$0xff] %v767_v2  }
  0xa6   : > { %v348_v35 = vpop.f32.mrf.mxu0  ;;  %v384_v59 = vpop.f32.mrf.mxu3 }
  0xa7   : > { %v936_v36 = vadd.f32 %v348_v35, %v267_v23  ;;  %v397_v37 = vmul.f32 %v934_v34, %v934_v34  ;;  %v385_v0 = vadd.f32 %v384_v59, %v956_v55 }
  0xa8   : > { %v377_v13 = vpop.f32.mrf.mxu1 }
  0xa9   : > { %410 = vadd.xlane.f32.xlu2 %v397_v37  ;;  %v394_v38 = vmul.f32 %v936_v36, %v936_v36  ;;  %v777_v3 = vpack.c.bf16 %v385_v0, %v383_v62  ;;  %v378_v50 = vadd.f32 %v377_v13, %v956_v55 }
  0xab   : > { %404 = vadd.xlane.f32.xlu1 %v394_v38  ;;  %788 = vst [vmem:[%s967_s30 + $0x10] sm:$0xff] %v777_v3  }
  0xac   : > { %v358_v39 = vpop.f32.mrf.mxu2 }
  0xad   : > { %v942_v40 = vadd.f32 %v358_v39, %v267_v23 }
  0xae   : > { %v350_v41 = vpop.f32.mrf.mxu0  ;;  %v387_v14 = vpop.f32.mrf.mxu3 }
  0xaf   : > { %v944_v42 = vadd.f32 %v350_v41, %v267_v23  ;;  %v398_v43 = vmul.f32 %v942_v40, %v942_v40 }
  0xb0   : > { %v379_v41 = vpop.f32.mrf.mxu1 }
  0xb1   : > { %412 = vadd.xlane.f32.xlu0 %v398_v43  ;;  %v395_v44 = vmul.f32 %v944_v42, %v944_v42 }
  0xb3   : > { %406 = vadd.xlane.f32.xlu1 %v395_v44 }
  0xb4   : > { %v360_v45 = vpop.f32.mrf.mxu2 }
  0xb5   : > { %v950_v46 = vadd.f32 %v360_v45, %v267_v23 }
  0xb6   : > { %v389_v43 = vpop.f32.mrf.mxu3 }
  0xb7   : > { %v399_v47 = vmul.f32 %v950_v46, %v950_v46 }
  0xbb   : > { %414 = vadd.xlane.f32.xlu1 %v399_v47 }
 0x10e   : > { %v401_v48 = vpop.xlane.xlu0 %400 }
 0x10f   : > { %v416_v49 = vadd.f32 1e-12, %v401_v48 }
 0x111   : > { %804 = vrsqrt.f32 %v416_v49  ;;  %vm430_vm2 = vweird.f32 %v416_v49 }
 0x114   : > { %v409_v52 = vpop.xlane.xlu2 %408 }
 0x115   : > { %v954_v53 = vadd.f32 1e-12, %v409_v52  ;;  %v388_v52 = vadd.f32 %v387_v14, %v956_v55 }
 0x116   : > { %v403_v54 = vpop.xlane.xlu0 %402 }
 0x117   : > { %v805_v56 = vpop.eup %804  ;;  %806 = vrsqrt.f32 %v954_v53  ;;  %v417_v57 = vadd.f32 1e-12, %v403_v54  ;;  %v390_v54 = vadd.f32 %v389_v43, %v956_v55  ;;  %vm470_vm8 = vweird.f32 %v954_v53 }
 0x118   : > { %v425_v60 = vmul.f32 %v805_v56, %v416_v49  ;;  %vm431_vm1 = vweird.f32 %v805_v56 }
 0x119   : > { %808 = vrsqrt.f32 %v417_v57  ;;  %vm982_vm3 = vmor %vm430_vm2, %vm431_vm1  ;;  %vm440_vm5 = vweird.f32 %v417_v57 }
 0x11a   : > { %v426_v1 = vmul.f32 %v805_v56, %v425_v60 }
 0x11c   : > { %v427_v4 = vmul.f32 0.5, %v426_v1  ;;  %v411_v5 = vpop.xlane.xlu2 %410 }
 0x11d   : > { %v969_v6 = vpop.eup %806  ;;  %v971_v7 = vadd.f32 1e-12, %v411_v5 }
 0x11e   : > { %v428_v8 = vsub.f32 1.5, %v427_v4  ;;  %v465_v9 = vmul.f32 %v969_v6, %v954_v53  ;;  %v405_v10 = vpop.xlane.xlu1 %404  ;;  %vm471_vm6 = vweird.f32 %v969_v6 }
 0x11f   : > { %v809_v11 = vpop.eup %808  ;;  %810 = vrsqrt.f32 %v971_v7  ;;  %v978_v12 = vadd.f32 1e-12, %v405_v10  ;;  %vm1018_vm10 = vmor %vm470_vm8, %vm471_vm6  ;;  %vm480_vm11 = vweird.f32 %v971_v7 }
 0x120   : > { %v466_v15 = vmul.f32 %v969_v6, %v465_v9  ;;  %v435_v16 = vmul.f32 %v809_v11, %v417_v57  ;;  %v429_v17 = vmul.f32 %v805_v56, %v428_v8  ;;  %vm441_vm4 = vweird.f32 %v809_v11 }
 0x121   : > { %812 = vrsqrt.f32 %v978_v12  ;;  %vm442_vm7 = vmor %vm440_vm5, %vm441_vm4  ;;  %vm450_vm14 = vweird.f32 %v978_v12 }
 0x122   : > { %v467_v18 = vmul.f32 0.5, %v466_v15  ;;  %v436_v19 = vmul.f32 %v809_v11, %v435_v16  ;;  %v433_v27 = vsel %vm982_vm3, %v805_v56, %v429_v17 }
 0x123   : > { %v504_v44 = vmul.f32 %v433_v27, %v920_v25  ;;  %v380_v25 = vadd.f32 %v379_v41, %v956_v55  ;;  %v782_v55 = vpack.c.bf16 %v390_v54, %v388_v52 }
 0x124   : > { %v437_v20 = vmul.f32 0.5, %v436_v19  ;;  %v413_v21 = vpop.xlane.xlu0 %412  ;;  %v468_v24 = vsub.f32 1.5, %v467_v18 }
 0x125   : > { %v811_v22 = vpop.eup %810  ;;  %v986_v26 = vadd.f32 1e-12, %v413_v21  ;;  %v772_v53 = vpack.c.bf16 %v380_v25, %v378_v50  ;;  %789 = vst [vmem:[%s967_s30 + $0x18] sm:$0xff] %v782_v55  }
 0x126   : > { %v438_v29 = vsub.f32 1.5, %v437_v20  ;;  %v475_v31 = vmul.f32 %v811_v22, %v971_v7  ;;  %v407_v32 = vpop.xlane.xlu1 %406  ;;  %v469_v45 = vmul.f32 %v969_v6, %v468_v24  ;;  %vm481_vm9 = vweird.f32 %v811_v22 }
 0x127   : > { %v991_v33 = vpop.eup %812  ;;  %814 = vrsqrt.f32 %v986_v26  ;;  %v994_v35 = vadd.f32 1e-12, %v407_v32  ;;  %vm482_vm12 = vmor %vm480_vm11, %vm481_vm9  ;;  %787 = vst [vmem:[%s967_s30 + $0x8] sm:$0xff] %v772_v53   ;;  %vm490_vm4 = vweird.f32 %v986_v26 }
 0x128   : > { %v439_v37 = vmul.f32 %v809_v11, %v438_v29  ;;  %v476_v38 = vmul.f32 %v811_v22, %v475_v31  ;;  %v445_v39 = vmul.f32 %v991_v33, %v978_v12  ;;  %v473_v60 = vsel %vm1018_vm10, %v969_v6, %v469_v45 }
 0x129   : > { %816 = vrsqrt.f32 %v994_v35  ;;  %vm451_vm13 = vweird.f32 %v991_v33  ;;  %v508_v7 = vmul.f32 %v473_v60, %v926_v28  ;;  %vm460_vm1 = vweird.f32 %v994_v35 }
 0x12a   : > { %v443_v47 = vsel %vm442_vm7, %v809_v11, %v439_v37  ;;  %v477_v48 = vmul.f32 0.5, %v476_v38  ;;  %v446_v49 = vmul.f32 %v991_v33, %v445_v39  ;;  %vm452_vm15 = vmor %vm450_vm14, %vm451_vm13 }
 0x12b   : > { %v505_v51 = vmul.f32 %v443_v47, %v928_v30 }
 0x12c   : > { %v478_v56 = vsub.f32 1.5, %v477_v48  ;;  %v447_v57 = vmul.f32 0.5, %v446_v49 }
 0x12d   : > { %v815_v58 = vpop.eup %814  ;;  %v747_v59 = vpack.c.bf16 %v505_v51, %v504_v44  ;;  %v544_v18 = vadd.f32 %v505_v51, %v504_v44 }
 0x12e   : > { %v479_v61 = vmul.f32 %v811_v22, %v478_v56  ;;  %v448_v62 = vsub.f32 1.5, %v447_v57  ;;  %v485_v63 = vmul.f32 %v815_v58, %v986_v26  ;;  %v415_v0 = vpop.xlane.xlu1 %414  ;;  %vm491_vm3 = vweird.f32 %v815_v58 }
 0x12f   : > { %v817_v1 = vpop.eup %816  ;;  %748 = vst [vmem:[%s1014_s9] sm:$0xff] %v747_v59   ;;  %v423_v2 = vadd.f32 1e-12, %v415_v0  ;;  %vm492_vm5 = vmor %vm490_vm4, %vm491_vm3 }
 0x130   : > { %v483_v3 = vsel %vm482_vm12, %v811_v22, %v479_v61  ;;  %v449_v4 = vmul.f32 %v991_v33, %v448_v62  ;;  %v486_v5 = vmul.f32 %v815_v58, %v485_v63  ;;  %v455_v6 = vmul.f32 %v817_v1, %v994_v35 }
 0x131   : > { %v509_v8 = vmul.f32 %v483_v3, %v934_v34  ;;  %818 = vrsqrt.f32 %v423_v2  ;;  %vm461_vm0 = vweird.f32 %v817_v1  ;;  %vm500_vm7 = vweird.f32 %v423_v2 }
 0x132   : > { %v487_v9 = vmul.f32 0.5, %v486_v5  ;;  %v456_v10 = vmul.f32 %v817_v1, %v455_v6  ;;  %v453_v13 = vsel %vm452_vm15, %v991_v33, %v449_v4  ;;  %vm462_vm2 = vmor %vm460_vm1, %vm461_vm0 }
 0x133   : > { %v757_v11 = vpack.c.bf16 %v509_v8, %v508_v7  ;;  %v506_v34 = vmul.f32 %v453_v13, %v936_v36 }
 0x134   : > { %v457_v14 = vmul.f32 0.5, %v456_v10  ;;  %v488_v15 = vsub.f32 1.5, %v487_v9 }
 0x135   : > { %785 = vst [vmem:[%s1014_s9 + $0x10] sm:$0xff] %v757_v11   ;;  %v545_v22 = vadd.f32 %v544_v18, %v506_v34 }
 0x136   : > { %v458_v16 = vsub.f32 1.5, %v457_v14  ;;  %v489_v19 = vmul.f32 %v815_v58, %v488_v15 }
 0x137   : > { %v819_v28 = vpop.eup %818 }
 0x138   : > { %v459_v17 = vmul.f32 %v817_v1, %v458_v16  ;;  %v495_v12 = vmul.f32 %v819_v28, %v423_v2  ;;  %v493_v29 = vsel %vm492_vm5, %v815_v58, %v489_v19  ;;  %vm501_vm6 = vweird.f32 %v819_v28 }
 0x139   : > { %v510_v35 = vmul.f32 %v493_v29, %v942_v40  ;;  %vm502_vm8 = vmor %vm500_vm7, %vm501_vm6 }
 0x13a   : > { %v463_v20 = vsel %vm462_vm2, %v817_v1, %v459_v17  ;;  %v496_v21 = vmul.f32 %v819_v28, %v495_v12 }
 0x13b   : > { %v507_v23 = vmul.f32 %v463_v20, %v944_v42 }
 0x13c   : > { %v497_v24 = vmul.f32 0.5, %v496_v21 }
 0x13d   : > { %v752_v27 = vpack.c.bf16 %v507_v23, %v506_v34  ;;  %v546_v36 = vadd.f32 %v545_v22, %v507_v23 }
 0x13e   : > { %v498_v31 = vsub.f32 1.5, %v497_v24 }
 0x13f   : > { %784 = vst [vmem:[%s1014_s9 + $0x8] sm:$0xff] %v752_v27   ;;  %v547_v32 = vadd.f32 %v546_v36, %v508_v7 }
 0x140   : > { %v499_v33 = vmul.f32 %v819_v28, %v498_v31 }
 0x141   : > { %v548_v42 = vadd.f32 %v547_v32, %v509_v8 }
 0x142   : > { %v503_v37 = vsel %vm502_vm8, %v819_v28, %v499_v33 }
 0x143   : > { %v511_v26 = vmul.f32 %v503_v37, %v950_v46  ;;  %v549_v38 = vadd.f32 %v548_v42, %v510_v35 }
 0x145   : > { %v762_v39 = vpack.c.bf16 %v511_v26, %v510_v35  ;;  %v550_v41 = vadd.f32 %v549_v38, %v511_v26 }
 0x147   : > { %786 = vst [vmem:[%s1014_s9 + $0x18] sm:$0xff] %v762_v39   ;;  %v551_v43 = vrot.slane %v550_v41, 4 }
 0x149   : > { %v552_v44 = vadd.f32 %v551_v43, %v550_v41 }
 0x14b   : > { %v553_v45 = vrot.slane %v552_v44, 2 }
 0x14d   : > { %v554_v47 = vadd.f32 %v553_v45, %v552_v44 }
 0x14f   : > { %v555_v48 = vrot.slane %v554_v47, 1 }
 0x151   : > { %v556_v40 = vadd.f32 %v555_v48, %v554_v47 }
 0x153   : > { %557 = vst [vmem:[%s249_s11] sm:$0x1] %v556_v40 }
 0x154 PF: > { %s16_s18 = sadd.s32 1, %s826_s18  }
 0x155   : > { %p13_p5 = scmp.ge.s32.totalorder %s16_s18, 4  }
 0x157   :  { %15 = sbr.rel (!%p13_p5) target bundleno = 1 (0x1), region = 86 }

// kernel: proxyclip_forward.3
= control target key start
LH: loop header
LB: loop body
LE: loop exit
PB: predicated region body
PF: predicated region fallthrough
CT: control target
= control target key end

     0   :  { %14 = vsyncpa [#allocation4], 0  ;;  %s2250_s0 = inlined_call_operand.vmem [shape: f32[2], index: 0, kind: input, shape index: {}]   ;;  %s2251_s1 = inlined_call_operand.vmem [shape: bf16[2,64,128], index: 1, kind: input, shape index: {}, may-alias: {1,2}]   ;;  %s2252_s2 = inlined_call_operand.vmem [shape: bf16[2,64,128], index: 2, kind: input, shape index: {}, may-alias: {1,2}]   ;;  %s2253_s3 = inlined_call_operand.vmem [shape: bf16[2,64,128], index: 3, kind: input, shape index: {}]   ;;  %s2254_s4 = inlined_call_operand.vmem [shape: bf16[128,128], index: 4, kind: input, shape index: {}]   ;;  %s2255_s5 = inlined_call_operand.vmem [shape: f32[1,128], index: 5, kind: input, shape index: {}]   ;;  %s2256_s6 = inlined_call_operand.vmem [shape: f32[1,128], index: 6, kind: input, shape index: {}]   ;;  %s2257_s7 = inlined_call_operand.vmem [shape: f32[1,128], index: 7, kind: input, shape index: {}]   ;;  %s2258_s8 = inlined_call_operand.vmem [shape: bf16[128,128], index: 8, kind: input, shape index: {}]   ;;  %s2259_s9 = inlined_call_operand.hbm [shape: f32[2,64,128], index: 9, kind: output, shape index: {}]  }
   0x1   :  { %15 = vsyncpa [#allocation3], 0 }
   0x2   :  { %17 = vsyncpa [#allocation3 + $0x1], 0  ;;  %s1925_s30 = smov 0   ;;  %s1927_s10 = smov 0  }
   0x3   :  { %s1929_s11 = smov 0   ;;  %s1931_s12 = smov 0  }
   0x4   :  { %s1933_s13 = smov 0   ;;  %s1935_s14 = smov 0  }
   0x5 LB: > { %s1467_s15 = sadd.s32 4294967295, %s1869_s14   ;;  %s1468_s16 = sadd.s32 4294967294, %s1869_s14   ;;  %s1869_s14 = sphi %s1935_s14, %s23_s14   ;;  %s1865_s13 = sphi %s1933_s13, %s2268_s13   ;;  %s1861_s12 = sphi %s1931_s12, %s2267_s12   ;;  %s1857_s11 = sphi %s1929_s11, %s2266_s11   ;;  %s1853_s10 = sphi %s1927_s10, %s2265_s10   ;;  %s1849_s30 = sphi %s1925_s30, %s2264_s30  }
   0x6   : > { %s35_s17 = sadd.s32 1, %s1865_s13  ;;  %s250_s18 = sadd.s32 1, %s1857_s11 }
   0x7   : > { %p37_p0 = scmp.ge.s32.totalorder %s35_s17, 2  ;;  %p260_p1 = scmp.ne.s32.totalorder %s1857_s11, %s1853_s10 }
   0x8   : > { %p261_p2 = scmp.eq.s32.totalorder %s1467_s15, 1  ;;  %p266_p3 = scmp.ne.s32.totalorder %s1853_s10, %s1849_s30 }
   0x9   : > { %s2270_s17 = smov (%p37_p0, %s35_s17), 0  ;;  %p267_p5 = scmp.eq.s32.totalorder %s1468_s16, 1 }
   0xa   : > { %p1965_p4 = por %p261_p2, %p260_p1  ;;  %s245_s20 = ssub.s32 %s1865_s13, %s2270_s17 }
   0xb   : > { %p1469_p6 = scmp.ge.s32.totalorder %s1869_s14, 1  ;;  %p248_p7 = scmp.eq.s32.totalorder %s245_s20, 0 }
   0xc   : > { %p1972_p8 = por %p267_p5, %p266_p3  ;;  %p274_p9 = scmp.lt.s32.totalorder %s1869_s14, 3 }
   0xd   : > { %s1978_s22 = scalar_select %p248_p7, %s1857_s11, %s250_s18  }
   0xe   : > { %p275_p10 = pnand %p1469_p6, %p274_p9  ;;  %p1648_p11 = scmp.eq.s32.totalorder %s1467_s15, 0 }
   0xf   : > { %s286_s25 = sshll.u32 %s2250_s0, 4  ;;  %s1871_s26 = smov [#allocation2]   ;;  %s287_s25 = int_to_ptr.vmem [resolvable:$true] %s286_s25 }
  0x10   : > { %p1640_p12 = pneg %p275_p10  ;;  %343 = sbr.rel (%p275_p10) target bundleno = 1168 (0x490), region = 56 }
  0x12   : > { %p1641_p13 = pnand %p1648_p11, %p1640_p12 }
  0x14   : > { %1643 = dma.vmem_to_smem (!%p1641_p13), %s287_s25, 16, %s1871_s26, [#allocation4]  }
  0x15   : > { %1840 = dma.done.wait (%p1648_p11), [#allocation4], 16  }
  0x16   : > { %1842 = vsyncadd (%p1648_p11), [#allocation4], 4294967280 }
  0x17   : > { %350 = sfence }
  0x18   : > { %p396_p0 = scmp.lt.s32.totalorder %s1861_s12, 1  ;;  %vm579_vm0 = vcmask 523264   ;;  %s392_s24 = sand.u32 1, %s1853_s10  }
  0x19   : > { %s1474_s25 = sshll.u32 %s392_s24, 6 }
  0x1a   : > { %s397_s27 = scalar_select %p396_p0, %s1861_s12, 1 }
  0x1c   : > { %s1602_s28 = sshll.u32 %s397_s27, 5  ;;  %s417_s27 = sld [smem:[#allocation2 + %s1861_s12]] }
  0x1d   : > { %s409_s16 = scalar_lea.vmem %s2252_s2, %s1602_s28  ;;  %s403_s23 = scalar_lea.vmem %s2251_s1, %s1602_s28 }
  0x1e   : > { %v1612_v0 = vld [vmem:[%s409_s16 + $0x18] sm:$0xff]  ;;  %v1611_v1 = vld [vmem:[%s409_s16 + $0x10] sm:$0xff]  ;;  %v1610_v2 = vld [vmem:[%s409_s16 + $0x8] sm:$0xff]  ;;  %s414_s26 = scalar_lea.vmem %s2253_s3, %s1602_s28 }
  0x1f   : > { %496 = vmatpush.bf16.xpose.msra.mxu0 %v1612_v0  ;;  %v1609_v3 = vld [vmem:[%s409_s16] sm:$0xff]  ;;  %v1606_v5 = vld [vmem:[%s403_s23 + $0x8] sm:$0xff]  ;;  %v1607_v6 = vld [vmem:[%s403_s23 + $0x10] sm:$0xff] }
  0x20   : > { %v1605_v4 = vld [vmem:[%s403_s23] sm:$0xff]  ;;  %v1608_v7 = vld [vmem:[%s403_s23 + $0x18] sm:$0xff]  ;;  %v1615_v9 = vld [vmem:[%s414_s26 + $0x10] sm:$0xff] }
  0x21   : > { %v1616_v8 = vld [vmem:[%s414_s26 + $0x18] sm:$0xff]  ;;  %v1614_v10 = vld [vmem:[%s414_s26 + $0x8] sm:$0xff]  ;;  %v1613_v11 = vld [vmem:[%s414_s26] sm:$0xff]  ;;  %s2195_s26 = scalar_lea.vmem [#allocation5], %s1474_s25 }
  0x22   : > { %656 = vmatpush.bf16.msra.mxu1 %v1616_v8  ;;  %s418_s29 = ssub.f32 1.0, %s417_s27  ;;  %v1995_v12 = vstv %s417_s27  ;;  %s1633_s27 = sshll.u32 %s1861_s12, 6 }
  0x23   : > { %s1348_s28 = scalar_lea.hbm %s2259_s9, %s1633_s27  ;;  %s1349_s16 = sshll.u32 %s2195_s26, 4  ;;  %s1350_s16 = int_to_ptr.vmem [resolvable:$true] %s1349_s16 }
  0x24   : > { %s419_s15 = smul.f32 3.0, %s418_s29  ;;  %s1351_s18 = sshll.u32 %s1348_s28, 4  ;;  %s1352_s18 = int_to_ptr.hbm [resolvable:$true] %s1351_s18 }
  0x25   : > { %s1335_s12 = scalar_lea.sflag [#allocation3], %s392_s24  ;;  %s1801_s20 = sshra.s32 %s1352_s18, 4  ;;  %s1802_s20 = int_to_ptr.hbm [resolvable:$true] %s1801_s20 }
  0x26   : > { %657 = vmatpush.bf16.msra.mxu1 %v1615_v9  ;;  %v1998_v15 = vstv %s419_s15  ;;  %s1803_s23 = scalar_lea.hbm %s1802_s20, 64  ;;  %s1807_s29 = scalar_lea.hbm %s2259_s9, 128 }
  0x27   : > { %497 = vmatpush.bf16.xpose.msra.mxu0 %v1611_v1  ;;  %p1804_p1 = scmp.ne.s32.totalorder %s1802_s20, %s1803_s23  ;;  %p1808_p5 = scmp.lt.s32.totalorder %s1802_s20, %s2259_s9 }
  0x28   : > { %p1809_p6 = scmp.lt.s32.totalorder %s1807_s29, %s1803_s23 }
  0x29   : > { %p1805_p2 = pnand %p1804_p1, %p1965_p4 }
  0x2a   : > { %658 = vmatpush.bf16.msra.mxu1 %v1614_v10  ;;  %p1810_p7 = por %p1809_p6, %p1808_p5 }
  0x2b   : > { %p1806_p3 = pneg %p1805_p2 }
  0x2d   : > { %p1811_p9 = pnand %p1810_p7, %p1806_p3 }
  0x2e   : > { %659 = vmatpush.bf16.msra.mxu1 %v1613_v11 }
  0x2f   : > { %498 = vmatpush.bf16.xpose.msra.mxu0 %v1610_v2 }
  0x37   : > { %499 = vmatpush.bf16.xpose.msra.mxu0 %v1609_v3 }
  0x3e   : > { %500 = vmatmul.bf16.vlgmr.msra.gmra.mxu0 %v1605_v4 }
  0x4e   : > { %505 = vmatmul.bf16.gmra.mxu0 %v1606_v5 }
  0x5e   : > { %510 = vmatmul.bf16.gmra.mxu0 %v1607_v6 }
  0x6e   : > { %515 = vmatmul.bf16.gmra.mxu0 %v1608_v7 }
  0xbb   : > { %v501_v13 = vpop.f32.mrf.mxu0 }
  0xbc   : > { %v522_v14 = vsub.f32 %v501_v13, %v1995_v12 }
  0xbe   : > { %v530_v16 = vmul.f32 3.0, %v522_v14 }
  0xc0   : > { %v547_v17 = vsub.f32 %v530_v16, %v1998_v15  ;;  %vm538_vm1 = vcmp.lt.f32.partialorder %v530_v16, 0.0 }
  0xc2   : > { %v555_v18 = vmul.f32 1.442695, %v547_v17 }
  0xc3   : > { %v503_v19 = vpop.f32.mrf.mxu0 }
  0xc4   : > { %1706 = vpow2.f32 %v555_v18  ;;  %v523_v20 = vsub.f32 %v503_v19, %v1995_v12  ;;  %v1623_v19 = vld [vmem:[%s2254_s4 + $0x30] sm:$0xff] }
  0xc6   : > { %v531_v21 = vmul.f32 3.0, %v523_v20  ;;  %v1622_v20 = vld [vmem:[%s2254_s4 + $0x28] sm:$0xff] }
  0xc8   : > { %v548_v22 = vsub.f32 %v531_v21, %v1998_v15  ;;  %vm539_vm2 = vcmp.lt.f32.partialorder %v531_v21, 0.0  ;;  %v1621_v21 = vld [vmem:[%s2254_s4 + $0x20] sm:$0xff] }
  0xca   : > { %v1707_v23 = vpop.eup %1706  ;;  %v557_v24 = vmul.f32 1.442695, %v548_v22  ;;  %v1620_v22 = vld [vmem:[%s2254_s4 + $0x18] sm:$0xff] }
  0xcb   : > { %v506_v25 = vpop.f32.mrf.mxu0  ;;  %v571_v26 = vsel %vm538_vm1, 0.0, %v1707_v23  ;;  %v1619_v23 = vld [vmem:[%s2254_s4 + $0x10] sm:$0xff] }
  0xcc   : > { %1708 = vpow2.f32 %v557_v24  ;;  %v524_v27 = vsub.f32 %v506_v25, %v1995_v12  ;;  %v580_v28 = vsel %vm579_vm0, %v571_v26, 0.0  ;;  %v1618_v24 = vld [vmem:[%s2254_s4 + $0x8] sm:$0xff]  ;;  %v1617_v25 = vld [vmem:[%s2254_s4] sm:$0xff] }
  0xcd   : > { %581 = vadd.xlane.f32.xlu0 %v580_v28 }
  0xce   : > { %v532_v29 = vmul.f32 3.0, %v524_v27 }
  0xd0   : > { %v549_v30 = vsub.f32 %v532_v29, %v1998_v15  ;;  %vm540_vm3 = vcmp.lt.f32.partialorder %v532_v29, 0.0 }
  0xd2   : > { %v1709_v31 = vpop.eup %1708  ;;  %v559_v32 = vmul.f32 1.442695, %v549_v30 }
  0xd3   : > { %v508_v33 = vpop.f32.mrf.mxu0  ;;  %v572_v34 = vsel %vm539_vm2, 0.0, %v1709_v31 }
  0xd4   : > { %1710 = vpow2.f32 %v559_v32  ;;  %v525_v35 = vsub.f32 %v508_v33, %v1995_v12  ;;  %v583_v36 = vsel %vm579_vm0, %v572_v34, 0.0  ;;  %v612_v37 = vpack.c.bf16 %v572_v34, %v571_v26 }
  0xd5   : > { %584 = vadd.xlane.f32.xlu0 %v583_v36 }
  0xd6   : > { %v533_v38 = vmul.f32 3.0, %v525_v35  ;;  %1529 = vmatmul.msk.bf16.vlgmr.msra.gmra.mxu1 %vm579_vm0, %v612_v37 }
  0xd8   : > { %v550_v39 = vsub.f32 %v533_v38, %v1998_v15  ;;  %vm541_vm4 = vcmp.lt.f32.partialorder %v533_v38, 0.0 }
  0xda   : > { %v1711_v40 = vpop.eup %1710  ;;  %v561_v41 = vmul.f32 1.442695, %v550_v39 }
  0xdb   : > { %v511_v42 = vpop.f32.mrf.mxu0  ;;  %v573_v43 = vsel %vm540_vm3, 0.0, %v1711_v40 }
  0xdc   : > { %1712 = vpow2.f32 %v561_v41  ;;  %v526_v44 = vsub.f32 %v511_v42, %v1995_v12  ;;  %v586_v45 = vsel %vm579_vm0, %v573_v43, 0.0 }
  0xdd   : > { %587 = vadd.xlane.f32.xlu1 %v586_v45 }
  0xde   : > { %v534_v46 = vmul.f32 3.0, %v526_v44 }
  0xe0   : > { %v551_v47 = vsub.f32 %v534_v46, %v1998_v15  ;;  %vm542_vm5 = vcmp.lt.f32.partialorder %v534_v46, 0.0 }
  0xe2   : > { %v1713_v48 = vpop.eup %1712  ;;  %v563_v49 = vmul.f32 1.442695, %v551_v47 }
  0xe3   : > { %v513_v50 = vpop.f32.mrf.mxu0  ;;  %v574_v51 = vsel %vm541_vm4, 0.0, %v1713_v48 }
  0xe4   : > { %1714 = vpow2.f32 %v563_v49  ;;  %v527_v52 = vsub.f32 %v513_v50, %v1995_v12  ;;  %v589_v53 = vsel %vm579_vm0, %v574_v51, 0.0  ;;  %v613_v54 = vpack.c.bf16 %v574_v51, %v573_v43 }
  0xe5   : > { %590 = vadd.xlane.f32.xlu1 %v589_v53 }
  0xe6   : > { %v535_v55 = vmul.f32 3.0, %v527_v52  ;;  %1530 = vmatmul.msk.bf16.gmra.mxu1 %vm579_vm0, %v613_v54 }
  0xe8   : > { %v552_v56 = vsub.f32 %v535_v55, %v1998_v15  ;;  %vm543_vm6 = vcmp.lt.f32.partialorder %v535_v55, 0.0 }
  0xea   : > { %v1715_v57 = vpop.eup %1714  ;;  %v565_v58 = vmul.f32 1.442695, %v552_v56 }
  0xeb   : > { %v516_v59 = vpop.f32.mrf.mxu0  ;;  %v575_v60 = vsel %vm542_vm5, 0.0, %v1715_v57 }
  0xec   : > { %1716 = vpow2.f32 %v565_v58  ;;  %v528_v61 = vsub.f32 %v516_v59, %v1995_v12  ;;  %v592_v62 = vsel %vm579_vm0, %v575_v60, 0.0 }
  0xed   : > { %593 = vadd.xlane.f32.xlu2 %v592_v62 }
  0xee   : > { %v536_v63 = vmul.f32 3.0, %v528_v61 }
  0xf0   : > { %v553_v0 = vsub.f32 %v536_v63, %v1998_v15  ;;  %vm544_vm7 = vcmp.lt.f32.partialorder %v536_v63, 0.0 }
  0xf2   : > { %v1717_v1 = vpop.eup %1716  ;;  %v567_v2 = vmul.f32 1.442695, %v553_v0 }
  0xf3   : > { %v518_v3 = vpop.f32.mrf.mxu0  ;;  %v576_v4 = vsel %vm543_vm6, 0.0, %v1717_v1 }
  0xf4   : > { %1718 = vpow2.f32 %v567_v2  ;;  %v529_v5 = vsub.f32 %v518_v3, %v1995_v12  ;;  %v595_v6 = vsel %vm579_vm0, %v576_v4, 0.0  ;;  %v614_v7 = vpack.c.bf16 %v576_v4, %v575_v60 }
  0xf5   : > { %596 = vadd.xlane.f32.xlu2 %v595_v6 }
  0xf6   : > { %v537_v8 = vmul.f32 3.0, %v529_v5  ;;  %1531 = vmatmul.msk.bf16.gmra.mxu1 %vm579_vm0, %v614_v7 }
  0xf8   : > { %v554_v9 = vsub.f32 %v537_v8, %v1998_v15  ;;  %vm545_vm8 = vcmp.lt.f32.partialorder %v537_v8, 0.0  ;;  %v1624_v15 = vld [vmem:[%s2254_s4 + $0x38] sm:$0xff] }
  0xf9   : > { %889 = vmatpush.bf16.msra.mxu2 %v1624_v15 }
  0xfa   : > { %v1719_v10 = vpop.eup %1718  ;;  %v569_v11 = vmul.f32 1.442695, %v554_v9 }
  0xfb   : > { %v577_v13 = vsel %vm544_vm7, 0.0, %v1719_v10 }
  0xfc   : > { %1720 = vpow2.f32 %v569_v11  ;;  %v598_v14 = vsel %vm579_vm0, %v577_v13, 0.0 }
  0xfd   : > { %599 = vadd.xlane.f32.xlu0 %v598_v14  ;;  %890 = vmatpush.bf16.msra.mxu2 %v1623_v19 }
 0x101   : > { %891 = vmatpush.bf16.msra.mxu2 %v1622_v20 }
 0x102   : > { %v1721_v16 = vpop.eup %1720 }
 0x103   : > { %v578_v12 = vsel %vm545_vm8, 0.0, %v1721_v16 }
 0x104   : > { %v601_v17 = vsel %vm579_vm0, %v578_v12, 0.0  ;;  %v615_v18 = vpack.c.bf16 %v578_v12, %v577_v13 }
 0x105   : > { %602 = vadd.xlane.f32.xlu1 %v601_v17  ;;  %892 = vmatpush.bf16.msra.mxu2 %v1621_v21 }
 0x106   : > { %1532 = vmatmul.msk.bf16.gmra.mxu1 %vm579_vm0, %v615_v18 }
 0x109   : > { %893 = vmatpush.bf16.msra.mxu2 %v1620_v22 }
 0x10d   : > { %894 = vmatpush.bf16.msra.mxu2 %v1619_v23 }
 0x111   : > { %895 = vmatpush.bf16.msra.mxu2 %v1618_v24 }
 0x115   : > { %896 = vmatpush.bf16.msra.mxu2 %v1617_v25 }
 0x140   : > { %v582_v26 = vpop.xlane.xlu0 %581 }
 0x141   : > { %vm681_vm9 = vcmp.gt.f32.partialorder %v582_v26, 0.0 }
 0x142   : > { %v689_v27 = vsel %vm681_vm9, %v582_v26, 1.0 }
 0x143   : > { %1722 = vrcp.f32 %v689_v27  ;;  %v708_v40 = vand.u32 2147483648, %v689_v27  ;;  %vm702_vm13 = vweird.f32 %v689_v27  ;;  %v706_v42 = vand.u32 2147483647, %v689_v27 }
 0x145   : > { %v709_v47 = vor.u32 1.1754944e-38, %v708_v40  ;;  %vm707_vm0 = vcmp.eq.f32.partialorder %v706_v42, 8.507059e+37 }
 0x148   : > { %v585_v28 = vpop.xlane.xlu0 %584 }
 0x149   : > { %v1723_v29 = vpop.eup %1722  ;;  %vm682_vm10 = vcmp.gt.f32.partialorder %v585_v28, 0.0 }
 0x14a   : > { %v698_v30 = vmul.f32 %v1723_v29, %v689_v27  ;;  %v690_v31 = vsel %vm682_vm10, %v585_v28, 1.0  ;;  %vm703_vm12 = vweird.f32 %v1723_v29 }
 0x14b   : > { %1724 = vrcp.f32 %v690_v31  ;;  %vm704_vm14 = vmor %vm702_vm13, %vm703_vm12  ;;  %v722_v43 = vand.u32 2147483648, %v690_v31  ;;  %v720_v46 = vand.u32 2147483647, %v690_v31  ;;  %vm716_vm1 = vweird.f32 %v690_v31 }
 0x14c   : > { %v699_v32 = vsub.f32 1.0, %v698_v30 }
 0x14d   : > { %v723_v52 = vor.u32 1.1754944e-38, %v722_v43  ;;  %vm721_vm4 = vcmp.eq.f32.partialorder %v720_v46, 8.507059e+37 }
 0x14e   : > { %v700_v33 = vmul.f32 %v1723_v29, %v699_v32 }
 0x150   : > { %v588_v34 = vpop.xlane.xlu1 %587  ;;  %v701_v38 = vadd.f32 %v1723_v29, %v700_v33 }
 0x151   : > { %v1725_v35 = vpop.eup %1724  ;;  %vm683_vm11 = vcmp.gt.f32.partialorder %v588_v34, 0.0 }
 0x152   : > { %v712_v36 = vmul.f32 %v1725_v35, %v690_v31  ;;  %v691_v37 = vsel %vm683_vm11, %v588_v34, 1.0  ;;  %v705_v44 = vsel %vm704_vm14, %v1723_v29, %v701_v38  ;;  %vm717_vm15 = vweird.f32 %v1725_v35 }
 0x153   : > { %1726 = vrcp.f32 %v691_v37  ;;  %v661_v39 = vpop.f32.mrf.mxu1  ;;  %v710_v51 = vsel %vm707_vm0, %v709_v47, %v705_v44  ;;  %vm718_vm3 = vmor %vm716_vm1, %vm717_vm15  ;;  %vm730_vm5 = vweird.f32 %v691_v37  ;;  %v734_v63 = vand.u32 2147483647, %v691_v37 }
 0x154   : > { %v713_v41 = vsub.f32 1.0, %v712_v36  ;;  %v809_v59 = vmul.f32 %v710_v51, %v661_v39  ;;  %v736_v0 = vand.u32 2147483648, %v691_v37 }
 0x155   : > { %vm735_vm9 = vcmp.eq.f32.partialorder %v734_v63, 8.507059e+37 }
 0x156   : > { %v714_v45 = vmul.f32 %v1725_v35, %v713_v41  ;;  %v737_v7 = vor.u32 1.1754944e-38, %v736_v0 }
 0x158   : > { %v591_v48 = vpop.xlane.xlu1 %590  ;;  %v715_v49 = vadd.f32 %v1725_v35, %v714_v45 }
 0x159   : > { %v1727_v50 = vpop.eup %1726  ;;  %vm684_vm2 = vcmp.gt.f32.partialorder %v591_v48, 0.0 }
 0x15a   : > { %v726_v53 = vmul.f32 %v1727_v50, %v691_v37  ;;  %v692_v54 = vsel %vm684_vm2, %v591_v48, 1.0  ;;  %v719_v55 = vsel %vm718_vm3, %v1725_v35, %v715_v49  ;;  %vm731_vm6 = vweird.f32 %v1727_v50 }
 0x15b   : > { %1728 = vrcp.f32 %v692_v54  ;;  %v663_v56 = vpop.f32.mrf.mxu1  ;;  %v724_v57 = vsel %vm721_vm4, %v723_v52, %v719_v55  ;;  %vm732_vm8 = vmor %vm730_vm5, %vm731_vm6  ;;  %vm744_vm10 = vweird.f32 %v692_v54  ;;  %v750_v8 = vand.u32 2147483648, %v692_v54 }
 0x15c   : > { %v727_v58 = vsub.f32 1.0, %v726_v53  ;;  %v810_v60 = vmul.f32 %v724_v57, %v663_v56  ;;  %v748_v11 = vand.u32 2147483647, %v692_v54 }
 0x15d   : > { %v751_v16 = vor.u32 1.1754944e-38, %v750_v8 }
 0x15e   : > { %v817_v61 = vpack.c.bf16 %v810_v60, %v809_v59  ;;  %v728_v62 = vmul.f32 %v1727_v50, %v727_v58  ;;  %vm749_vm13 = vcmp.eq.f32.partialorder %v748_v11, 8.507059e+37 }
 0x160   : > { %897 = vmatmul.bf16.vlgmr.msra.gmra.mxu2 %v817_v61  ;;  %v594_v1 = vpop.xlane.xlu2 %593  ;;  %v729_v2 = vadd.f32 %v1727_v50, %v728_v62 }
 0x161   : > { %v1729_v3 = vpop.eup %1728  ;;  %vm685_vm7 = vcmp.gt.f32.partialorder %v594_v1, 0.0 }
 0x162   : > { %v740_v4 = vmul.f32 %v1729_v3, %v692_v54  ;;  %v693_v5 = vsel %vm685_vm7, %v594_v1, 1.0  ;;  %v733_v10 = vsel %vm732_vm8, %v1727_v50, %v729_v2  ;;  %vm745_vm11 = vweird.f32 %v1729_v3 }
 0x163   : > { %1730 = vrcp.f32 %v693_v5  ;;  %v666_v6 = vpop.f32.mrf.mxu1  ;;  %v738_v14 = vsel %vm735_vm9, %v737_v7, %v733_v10  ;;  %vm746_vm12 = vmor %vm744_vm10, %vm745_vm11  ;;  %vm758_vm15 = vweird.f32 %v693_v5  ;;  %v762_v28 = vand.u32 2147483647, %v693_v5 }
 0x164   : > { %v741_v9 = vsub.f32 1.0, %v740_v4  ;;  %v811_v19 = vmul.f32 %v738_v14, %v666_v6  ;;  %v764_v29 = vand.u32 2147483648, %v693_v5 }
 0x165   : > { %vm763_vm3 = vcmp.eq.f32.partialorder %v762_v28, 8.507059e+37 }
 0x166   : > { %v742_v13 = vmul.f32 %v1729_v3, %v741_v9  ;;  %v765_v37 = vor.u32 1.1754944e-38, %v764_v29 }
 0x168   : > { %v597_v12 = vpop.xlane.xlu2 %596  ;;  %v743_v17 = vadd.f32 %v1729_v3, %v742_v13 }
 0x169   : > { %v1731_v18 = vpop.eup %1730  ;;  %vm686_vm14 = vcmp.gt.f32.partialorder %v597_v12, 0.0 }
 0x16a   : > { %v754_v15 = vmul.f32 %v1731_v18, %v693_v5  ;;  %v694_v20 = vsel %vm686_vm14, %v597_v12, 1.0  ;;  %v747_v21 = vsel %vm746_vm12, %v1729_v3, %v743_v17  ;;  %vm759_vm0 = vweird.f32 %v1731_v18  ;;  %v1703_v12 = vld [vmem:[%s2255_s5] ss:$0 sm:$0xff] }
 0x16b   : > { %1732 = vrcp.f32 %v694_v20  ;;  %v668_v22 = vpop.f32.mrf.mxu1  ;;  %v752_v23 = vsel %vm749_vm13, %v751_v16, %v747_v21  ;;  %vm2051_vm1 = vmor %vm758_vm15, %vm759_vm0  ;;  %vm772_vm4 = vweird.f32 %v694_v20  ;;  %v778_v38 = vand.u32 2147483648, %v694_v20 }
 0x16c   : > { %v755_v24 = vsub.f32 1.0, %v754_v15  ;;  %v812_v25 = vmul.f32 %v752_v23, %v668_v22  ;;  %v776_v41 = vand.u32 2147483647, %v694_v20 }
 0x16d   : > { %v779_v44 = vor.u32 1.1754944e-38, %v778_v38 }
 0x16e   : > { %v818_v26 = vpack.c.bf16 %v812_v25, %v811_v19  ;;  %v756_v27 = vmul.f32 %v1731_v18, %v755_v24  ;;  %vm777_vm7 = vcmp.eq.f32.partialorder %v776_v41, 8.507059e+37 }
 0x170   : > { %902 = vmatmul.bf16.gmra.mxu2 %v818_v26  ;;  %v757_v30 = vadd.f32 %v1731_v18, %v756_v27  ;;  %v600_v31 = vpop.xlane.xlu0 %599 }
 0x171   : > { %v1733_v32 = vpop.eup %1732  ;;  %vm687_vm2 = vcmp.gt.f32.partialorder %v600_v31, 0.0 }
 0x172   : > { %v768_v34 = vmul.f32 %v1733_v32, %v694_v20  ;;  %v695_v35 = vsel %vm687_vm2, %v600_v31, 1.0  ;;  %v761_v40 = vsel %vm2051_vm1, %v1731_v18, %v757_v30  ;;  %vm773_vm5 = vweird.f32 %v1733_v32 }
 0x173   : > { %v671_v36 = vpop.f32.mrf.mxu1  ;;  %1734 = vrcp.f32 %v695_v35  ;;  %v766_v43 = vsel %vm763_vm3, %v765_v37, %v761_v40  ;;  %vm774_vm6 = vmor %vm772_vm4, %vm773_vm5  ;;  %vm786_vm9 = vweird.f32 %v695_v35  ;;  %v790_v58 = vand.u32 2147483647, %v695_v35 }
 0x174   : > { %v769_v39 = vsub.f32 1.0, %v768_v34  ;;  %v813_v48 = vmul.f32 %v766_v43, %v671_v36  ;;  %v792_v59 = vand.u32 2147483648, %v695_v35  ;;  %v1872_v30 = vmov 128.0  }
 0x175   : > { %vm791_vm12 = vcmp.eq.f32.partialorder %v790_v58, 8.507059e+37 }
 0x176   : > { %v770_v42 = vmul.f32 %v1733_v32, %v769_v39  ;;  %v793_v0 = vor.u32 1.1754944e-38, %v792_v59 }
 0x178   : > { %v603_v45 = vpop.xlane.xlu1 %602  ;;  %v771_v46 = vadd.f32 %v1733_v32, %v770_v42 }
 0x179   : > { %v1735_v47 = vpop.eup %1734  ;;  %vm688_vm8 = vcmp.gt.f32.partialorder %v603_v45, 0.0 }
 0x17a   : > { %v782_v49 = vmul.f32 %v1735_v47, %v695_v35  ;;  %v696_v50 = vsel %vm688_vm8, %v603_v45, 1.0  ;;  %v775_v51 = vsel %vm774_vm6, %v1733_v32, %v771_v46  ;;  %vm787_vm10 = vweird.f32 %v1735_v47 }
 0x17b   : > { %1736 = vrcp.f32 %v696_v50  ;;  %v673_v52 = vpop.f32.mrf.mxu1  ;;  %v780_v53 = vsel %vm777_vm7, %v779_v44, %v775_v51  ;;  %vm788_vm11 = vmor %vm786_vm9, %vm787_vm10  ;;  %vm800_vm13 = vweird.f32 %v696_v50  ;;  %v806_v1 = vand.u32 2147483648, %v696_v50 }
 0x17c   : > { %v783_v54 = vsub.f32 1.0, %v782_v49  ;;  %v814_v55 = vmul.f32 %v780_v53, %v673_v52  ;;  %v804_v4 = vand.u32 2147483647, %v696_v50  ;;  %1738 = vrcp.f32 %v1872_v30 }
 0x17d   : > { %v807_v7 = vor.u32 1.1754944e-38, %v806_v1 }
 0x17e   : > { %v819_v56 = vpack.c.bf16 %v814_v55, %v813_v48  ;;  %v784_v57 = vmul.f32 %v1735_v47, %v783_v54  ;;  %vm805_vm0 = vcmp.eq.f32.partialorder %v804_v4, 8.507059e+37  ;;  %v1631_v4 = vld [vmem:[%s2258_s8 + $0x30] sm:$0xff] }
 0x180   : > { %907 = vmatmul.bf16.gmra.mxu2 %v819_v56  ;;  %v785_v60 = vadd.f32 %v1735_v47, %v784_v57 }
 0x181   : > { %v1737_v61 = vpop.eup %1736 }
 0x182   : > { %v796_v62 = vmul.f32 %v1737_v61, %v696_v50  ;;  %v789_v3 = vsel %vm788_vm11, %v1735_v47, %v785_v60  ;;  %vm801_vm14 = vweird.f32 %v1737_v61  ;;  %v1739_v31 = vpop.eup %1738 }
 0x183   : > { %v676_v63 = vpop.f32.mrf.mxu1  ;;  %v794_v6 = vsel %vm791_vm12, %v793_v0, %v789_v3  ;;  %vm802_vm15 = vmor %vm800_vm13, %vm801_vm14  ;;  %v935_v32 = vmul.f32 128.0, %v1739_v31  ;;  %vm939_vm1 = vweird.f32 %v1739_v31  ;;  %v1632_v3 = vld [vmem:[%s2258_s8 + $0x38] sm:$0xff] }
 0x184   : > { %v797_v2 = vsub.f32 1.0, %v796_v62  ;;  %v815_v9 = vmul.f32 %v794_v6, %v676_v63  ;;  %1177 = vmatpush.bf16.msra.mxu3 %v1632_v3  ;;  %v1629_v6 = vld [vmem:[%s2258_s8 + $0x20] sm:$0xff] }
 0x185   : > { %v936_v33 = vsub.f32 1.0, %v935_v32 }
 0x186   : > { %v798_v5 = vmul.f32 %v1737_v61, %v797_v2 }
 0x187   : > { %v937_v34 = vmul.f32 %v1739_v31, %v936_v33 }
 0x188   : > { %v799_v8 = vadd.f32 %v1737_v61, %v798_v5  ;;  %1178 = vmatpush.bf16.msra.mxu3 %v1631_v4  ;;  %v1630_v5 = vld [vmem:[%s2258_s8 + $0x28] sm:$0xff] }
 0x189   : > { %v938_v35 = vadd.f32 %v1739_v31, %v937_v34 }
 0x18a   : > { %v803_v10 = vsel %vm802_vm15, %v1737_v61, %v799_v8  ;;  %v1627_v8 = vld [vmem:[%s2258_s8 + $0x10] sm:$0xff] }
 0x18b   : > { %v678_v11 = vpop.f32.mrf.mxu1  ;;  %v808_v13 = vsel %vm805_vm0, %v807_v7, %v803_v10  ;;  %v2060_v36 = vsel %vm939_vm1, %v1739_v31, %v938_v35  ;;  %v1628_v7 = vld [vmem:[%s2258_s8 + $0x18] sm:$0xff] }
 0x18c   : > { %v816_v14 = vmul.f32 %v808_v13, %v678_v11  ;;  %1179 = vmatpush.bf16.msra.mxu3 %v1630_v5  ;;  %v1625_v13 = vld [vmem:[%s2258_s8] sm:$0xff] }
 0x18e   : > { %v820_v16 = vpack.c.bf16 %v816_v14, %v815_v9  ;;  %v1626_v9 = vld [vmem:[%s2258_s8 + $0x8] sm:$0xff] }
 0x190   : > { %912 = vmatmul.bf16.gmra.mxu2 %v820_v16  ;;  %1180 = vmatpush.bf16.msra.mxu3 %v1629_v6 }
 0x194   : > { %1181 = vmatpush.bf16.msra.mxu3 %v1628_v7 }
 0x198   : > { %1182 = vmatpush.bf16.msra.mxu3 %v1627_v8 }
 0x19c   : > { %1183 = vmatpush.bf16.msra.mxu3 %v1626_v9 }
 0x1a0   : > { %1184 = vmatpush.bf16.msra.mxu3 %v1625_v13 }
 0x1e3   : > { %v898_v17 = vpop.f32.mrf.mxu2 }
 0x1e4   : > { %v899_v18 = vadd.f32 %v1703_v12, %v898_v17 }
 0x1e6   : > { %918 = vadd.xlane.f32.xlu2 %v899_v18 }
 0x1eb   : > { %v900_v15 = vpop.f32.mrf.mxu2 }
 0x1ec   : > { %v901_v19 = vadd.f32 %v1703_v12, %v900_v15 }
 0x1ee   : > { %920 = vadd.xlane.f32.xlu0 %v901_v19 }
 0x1f3   : > { %v903_v20 = vpop.f32.mrf.mxu2 }
 0x1f4   : > { %v904_v21 = vadd.f32 %v1703_v12, %v903_v20 }
 0x1f6   : > { %922 = vadd.xlane.f32.xlu1 %v904_v21 }
 0x1fb   : > { %v905_v22 = vpop.f32.mrf.mxu2 }
 0x1fc   : > { %v906_v23 = vadd.f32 %v1703_v12, %v905_v22 }
 0x1fe   : > { %924 = vadd.xlane.f32.xlu2 %v906_v23 }
 0x203   : > { %v908_v24 = vpop.f32.mrf.mxu2 }
 0x204   : > { %v909_v25 = vadd.f32 %v1703_v12, %v908_v24 }
 0x206   : > { %926 = vadd.xlane.f32.xlu0 %v909_v25 }
 0x20b   : > { %v910_v26 = vpop.f32.mrf.mxu2 }
 0x20c   : > { %v911_v27 = vadd.f32 %v1703_v12, %v910_v26 }
 0x20e   : > { %928 = vadd.xlane.f32.xlu1 %v911_v27 }
 0x213   : > { %v913_v28 = vpop.f32.mrf.mxu2 }
 0x214   : > { %v914_v29 = vadd.f32 %v1703_v12, %v913_v28 }
 0x216   : > { %930 = vadd.xlane.f32.xlu1 %v914_v29 }
 0x21b   : > { %v915_v43 = vpop.f32.mrf.mxu2 }
 0x21c   : > { %v916_v45 = vadd.f32 %v1703_v12, %v915_v43  ;;  %v2134_v43 = vld [vmem:[%s2256_s6] ss:$0 sm:$0xff] }
 0x259   : > { %v919_v37 = vpop.xlane.xlu2 %918 }
 0x25a   : > { %v941_v38 = vmul.f32 %v2060_v36, %v919_v37 }
 0x25c   : > { %v2063_v39 = vsub.f32 %v899_v18, %v941_v38 }
 0x25e   : > { %v957_v40 = vmul.f32 %v2063_v39, %v2063_v39 }
 0x260   : > { %965 = vadd.xlane.f32.xlu2 %v957_v40 }
 0x261   : > { %v921_v41 = vpop.xlane.xlu0 %920 }
 0x262   : > { %v942_v42 = vmul.f32 %v2060_v36, %v921_v41 }
 0x264   : > { %v2068_v44 = vsub.f32 %v901_v19, %v942_v42 }
 0x266   : > { %v958_v46 = vmul.f32 %v2068_v44, %v2068_v44 }
 0x268   : > { %967 = vadd.xlane.f32.xlu0 %v958_v46  ;;  %932 = vadd.xlane.f32.xlu2 %v916_v45 }
 0x269   : > { %v923_v47 = vpop.xlane.xlu1 %922 }
 0x26a   : > { %v943_v48 = vmul.f32 %v2060_v36, %v923_v47 }
 0x26c   : > { %v2073_v49 = vsub.f32 %v904_v21, %v943_v48 }
 0x26e   : > { %v959_v50 = vmul.f32 %v2073_v49, %v2073_v49 }
 0x270   : > { %969 = vadd.xlane.f32.xlu0 %v959_v50 }
 0x271   : > { %v925_v51 = vpop.xlane.xlu2 %924 }
 0x272   : > { %v944_v52 = vmul.f32 %v2060_v36, %v925_v51 }
 0x274   : > { %v2078_v53 = vsub.f32 %v906_v23, %v944_v52 }
 0x276   : > { %v960_v54 = vmul.f32 %v2078_v53, %v2078_v53 }
 0x278   : > { %971 = vadd.xlane.f32.xlu1 %v960_v54 }
 0x279   : > { %v927_v55 = vpop.xlane.xlu0 %926 }
 0x27a   : > { %v945_v56 = vmul.f32 %v2060_v36, %v927_v55 }
 0x27c   : > { %v2083_v57 = vsub.f32 %v909_v25, %v945_v56 }
 0x27e   : > { %v961_v58 = vmul.f32 %v2083_v57, %v2083_v57 }
 0x280   : > { %973 = vadd.xlane.f32.xlu2 %v961_v58 }
 0x281   : > { %v929_v59 = vpop.xlane.xlu1 %928 }
 0x282   : > { %v946_v60 = vmul.f32 %v2060_v36, %v929_v59 }
 0x284   : > { %v2088_v61 = vsub.f32 %v911_v27, %v946_v60 }
 0x286   : > { %v962_v62 = vmul.f32 %v2088_v61, %v2088_v61 }
 0x288   : > { %975 = vadd.xlane.f32.xlu0 %v962_v62 }
 0x289   : > { %v931_v63 = vpop.xlane.xlu1 %930 }
 0x28a   : > { %v947_v0 = vmul.f32 %v2060_v36, %v931_v63 }
 0x28c   : > { %v2093_v1 = vsub.f32 %v914_v29, %v947_v0 }
 0x28e   : > { %v963_v2 = vmul.f32 %v2093_v1, %v2093_v1 }
 0x290   : > { %977 = vadd.xlane.f32.xlu1 %v963_v2 }
 0x2d3   : > { %v966_v10 = vpop.xlane.xlu2 %965 }
 0x2d4   : > { %v981_v11 = vmul.f32 %v966_v10, %v2060_v36 }
 0x2d6   : > { %v989_v14 = vadd.f32 1e-05, %v981_v11 }
 0x2d8   : > { %1740 = vrsqrt.f32 %v989_v14  ;;  %vm1003_vm3 = vweird.f32 %v989_v14 }
 0x2db   : > { %v968_v16 = vpop.xlane.xlu0 %967  ;;  %v933_v12 = vpop.xlane.xlu2 %932 }
 0x2dc   : > { %v982_v17 = vmul.f32 %v968_v16, %v2060_v36  ;;  %v948_v18 = vmul.f32 %v2060_v36, %v933_v12 }
 0x2de   : > { %v1741_v15 = vpop.eup %1740  ;;  %v990_v19 = vadd.f32 1e-05, %v982_v17  ;;  %v2124_v20 = vsub.f32 %v916_v45, %v948_v18 }
 0x2df   : > { %v998_v21 = vmul.f32 %v1741_v15, %v989_v14  ;;  %vm1004_vm2 = vweird.f32 %v1741_v15 }
 0x2e0   : > { %1742 = vrsqrt.f32 %v990_v19  ;;  %v964_v22 = vmul.f32 %v2124_v20, %v2124_v20  ;;  %vm1005_vm4 = vmor %vm1003_vm3, %vm1004_vm2  ;;  %vm1013_vm6 = vweird.f32 %v990_v19 }
 0x2e1   : > { %v999_v23 = vmul.f32 %v1741_v15, %v998_v21 }
 0x2e2   : > { %979 = vadd.xlane.f32.xlu2 %v964_v22 }
 0x2e3   : > { %v1000_v24 = vmul.f32 0.5, %v999_v23  ;;  %v970_v25 = vpop.xlane.xlu0 %969 }
 0x2e4   : > { %v983_v26 = vmul.f32 %v970_v25, %v2060_v36 }
 0x2e5   : > { %v1001_v27 = vsub.f32 1.5, %v1000_v24 }
 0x2e6   : > { %v1743_v28 = vpop.eup %1742  ;;  %v991_v29 = vadd.f32 1e-05, %v983_v26 }
 0x2e7   : > { %v1002_v30 = vmul.f32 %v1741_v15, %v1001_v27  ;;  %v1008_v31 = vmul.f32 %v1743_v28, %v990_v19  ;;  %vm1014_vm5 = vweird.f32 %v1743_v28 }
 0x2e8   : > { %1744 = vrsqrt.f32 %v991_v29  ;;  %vm1015_vm7 = vmor %vm1013_vm6, %vm1014_vm5  ;;  %vm1023_vm9 = vweird.f32 %v991_v29 }
 0x2e9   : > { %v1009_v32 = vmul.f32 %v1743_v28, %v1008_v31  ;;  %v1006_v35 = vsel %vm1005_vm4, %v1741_v15, %v1002_v30 }
 0x2ea   : > { %v1077_v42 = vmul.f32 %v1006_v35, %v2063_v39  ;;  %v2141_v39 = vld [vmem:[%s2257_s7] ss:$0 sm:$0xff] }
 0x2eb   : > { %v1010_v33 = vmul.f32 0.5, %v1009_v32  ;;  %v972_v34 = vpop.xlane.xlu1 %971 }
 0x2ec   : > { %v984_v37 = vmul.f32 %v972_v34, %v2060_v36  ;;  %v1089_v51 = vmul.f32 %v2134_v43, %v1077_v42 }
 0x2ed   : > { %v1011_v38 = vsub.f32 1.5, %v1010_v33 }
 0x2ee   : > { %v1745_v40 = vpop.eup %1744  ;;  %v992_v41 = vadd.f32 1e-05, %v984_v37  ;;  %v1101_v62 = vadd.f32 %v2141_v39, %v1089_v51 }
 0x2ef   : > { %v1012_v45 = vmul.f32 %v1743_v28, %v1011_v38  ;;  %v1018_v46 = vmul.f32 %v1745_v40, %v991_v29  ;;  %vm1024_vm8 = vweird.f32 %v1745_v40 }
 0x2f0   : > { %1746 = vrsqrt.f32 %v992_v41  ;;  %vm1025_vm10 = vmor %vm1023_vm9, %vm1024_vm8  ;;  %vm1033_vm12 = vweird.f32 %v992_v41 }
 0x2f1   : > { %v1019_v47 = vmul.f32 %v1745_v40, %v1018_v46  ;;  %v1016_v48 = vsel %vm1015_vm7, %v1743_v28, %v1012_v45 }
 0x2f2   : > { %v1078_v50 = vmul.f32 %v1016_v48, %v2068_v44 }
 0x2f3   : > { %v1020_v52 = vmul.f32 0.5, %v1019_v47  ;;  %v974_v54 = vpop.xlane.xlu2 %973 }
 0x2f4   : > { %v985_v55 = vmul.f32 %v974_v54, %v2060_v36  ;;  %v1090_v56 = vmul.f32 %v2134_v43, %v1078_v50 }
 0x2f5   : > { %v1021_v58 = vsub.f32 1.5, %v1020_v52 }
 0x2f6   : > { %v1747_v59 = vpop.eup %1746  ;;  %v993_v60 = vadd.f32 1e-05, %v985_v55  ;;  %v1102_v44 = vadd.f32 %v2141_v39, %v1090_v56 }
 0x2f7   : > { %v1022_v63 = vmul.f32 %v1745_v40, %v1021_v58  ;;  %v1028_v0 = vmul.f32 %v1747_v59, %v992_v41  ;;  %vm1034_vm11 = vweird.f32 %v1747_v59 }
 0x2f8   : > { %1748 = vrsqrt.f32 %v993_v60  ;;  %v1109_v2 = vpack.c.bf16 %v1102_v44, %v1101_v62  ;;  %vm1035_vm13 = vmor %vm1033_vm12, %vm1034_vm11  ;;  %vm1043_vm15 = vweird.f32 %v993_v60 }
 0x2f9   : > { %v1029_v3 = vmul.f32 %v1747_v59, %v1028_v0  ;;  %v1026_v6 = vsel %vm1025_vm10, %v1745_v40, %v1022_v63 }
 0x2fa   : > { %1185 = vmatmul.bf16.vlgmr.msra.gmra.mxu3 %v1109_v2  ;;  %v1079_v11 = vmul.f32 %v1026_v6, %v2073_v49 }
 0x2fb   : > { %v1030_v4 = vmul.f32 0.5, %v1029_v3  ;;  %v976_v5 = vpop.xlane.xlu0 %975 }
 0x2fc   : > { %v986_v7 = vmul.f32 %v976_v5, %v2060_v36  ;;  %v1091_v18 = vmul.f32 %v2134_v43, %v1079_v11 }
 0x2fd   : > { %v1031_v8 = vsub.f32 1.5, %v1030_v4 }
 0x2fe   : > { %v1749_v9 = vpop.eup %1748  ;;  %v994_v10 = vadd.f32 1e-05, %v986_v7  ;;  %v1103_v23 = vadd.f32 %v2141_v39, %v1091_v18 }
 0x2ff   : > { %v1032_v13 = vmul.f32 %v1747_v59, %v1031_v8  ;;  %v1038_v14 = vmul.f32 %v1749_v9, %v993_v60  ;;  %vm1044_vm14 = vweird.f32 %v1749_v9 }
 0x300   : > { %1750 = vrsqrt.f32 %v994_v10  ;;  %vm1045_vm0 = vmor %vm1043_vm15, %vm1044_vm14  ;;  %vm1053_vm2 = vweird.f32 %v994_v10 }
 0x301   : > { %v1039_v16 = vmul.f32 %v1749_v9, %v1038_v14  ;;  %v1036_v12 = vsel %vm1035_vm13, %v1747_v59, %v1032_v13 }
 0x302   : > { %v1080_v17 = vmul.f32 %v1036_v12, %v2078_v53 }
 0x303   : > { %v1040_v15 = vmul.f32 0.5, %v1039_v16  ;;  %v978_v41 = vpop.xlane.xlu1 %977 }
 0x304   : > { %v1092_v19 = vmul.f32 %v2134_v43, %v1080_v17  ;;  %v987_v42 = vmul.f32 %v978_v41, %v2060_v36 }
 0x305   : > { %v1041_v21 = vsub.f32 1.5, %v1040_v15 }
 0x306   : > { %v1751_v22 = vpop.eup %1750  ;;  %v1104_v49 = vadd.f32 %v2141_v39, %v1092_v19 }
 0x307   : > { %v1042_v24 = vmul.f32 %v1749_v9, %v1041_v21  ;;  %v1048_v25 = vmul.f32 %v1751_v22, %v994_v10  ;;  %vm1054_vm1 = vweird.f32 %v1751_v22 }
 0x308   : > { %v1110_v26 = vpack.c.bf16 %v1104_v49, %v1103_v23  ;;  %vm1055_vm3 = vmor %vm1053_vm2, %vm1054_vm1 }
 0x309   : > { %v1049_v27 = vmul.f32 %v1751_v22, %v1048_v25  ;;  %v1046_v28 = vsel %vm1045_vm0, %v1749_v9, %v1042_v24 }
 0x30a   : > { %1190 = vmatmul.bf16.gmra.mxu3 %v1110_v26  ;;  %v1081_v30 = vmul.f32 %v1046_v28, %v2083_v57  ;;  %v995_v57 = vadd.f32 1e-05, %v987_v42 }
 0x30b   : > { %v1050_v53 = vmul.f32 0.5, %v1049_v27 }
 0x30c   : > { %v1093_v34 = vmul.f32 %v2134_v43, %v1081_v30  ;;  %1752 = vrsqrt.f32 %v995_v57  ;;  %vm1063_vm5 = vweird.f32 %v995_v57 }
 0x30d   : > { %v1051_v29 = vsub.f32 1.5, %v1050_v53 }
 0x30e   : > { %v1105_v37 = vadd.f32 %v2141_v39, %v1093_v34 }
 0x30f   : > { %v1052_v31 = vmul.f32 %v1751_v22, %v1051_v29 }
 0x311   : > { %v1056_v32 = vsel %vm1055_vm3, %v1751_v22, %v1052_v31 }
 0x312   : > { %v1082_v33 = vmul.f32 %v1056_v32, %v2088_v61  ;;  %v1753_v45 = vpop.eup %1752 }
 0x313   : > { %v1058_v46 = vmul.f32 %v1753_v45, %v995_v57  ;;  %vm1064_vm4 = vweird.f32 %v1753_v45 }
 0x314   : > { %v1094_v35 = vmul.f32 %v2134_v43, %v1082_v33  ;;  %vm1065_vm6 = vmor %vm1063_vm5, %vm1064_vm4 }
 0x315   : > { %v1059_v47 = vmul.f32 %v1753_v45, %v1058_v46 }
 0x316   : > { %v1106_v38 = vadd.f32 %v2141_v39, %v1094_v35 }
 0x317   : > { %v1060_v51 = vmul.f32 0.5, %v1059_v47 }
 0x318   : > { %v1111_v40 = vpack.c.bf16 %v1106_v38, %v1105_v37 }
 0x319   : > { %v1061_v52 = vsub.f32 1.5, %v1060_v51 }
 0x31a   : > { %1195 = vmatmul.bf16.gmra.mxu3 %v1111_v40 }
 0x31b   : > { %v1062_v55 = vmul.f32 %v1753_v45, %v1061_v52 }
 0x31d   : > { %v1066_v60 = vsel %vm1065_vm6, %v1753_v45, %v1062_v55 }
 0x31e   : > { %v1083_v44 = vmul.f32 %v1066_v60, %v2093_v1 }
 0x320   : > { %v1095_v2 = vmul.f32 %v2134_v43, %v1083_v44 }
 0x322   : > { %v1107_v4 = vadd.f32 %v2141_v39, %v1095_v2 }
 0x355   : > { %v980_v48 = vpop.xlane.xlu2 %979 }
 0x356   : > { %v988_v61 = vmul.f32 %v980_v48, %v2060_v36 }
 0x358   : > { %v996_v50 = vadd.f32 1e-05, %v988_v61 }
 0x35a   : > { %1754 = vrsqrt.f32 %v996_v50  ;;  %vm1073_vm8 = vweird.f32 %v996_v50 }
 0x360   : > { %v1755_v54 = vpop.eup %1754 }
 0x361   : > { %v1068_v56 = vmul.f32 %v1755_v54, %v996_v50  ;;  %vm1074_vm7 = vweird.f32 %v1755_v54 }
 0x362   : > { %vm1075_vm9 = vmor %vm1073_vm8, %vm1074_vm7 }
 0x363   : > { %v1069_v58 = vmul.f32 %v1755_v54, %v1068_v56 }
 0x365   : > { %v1070_v59 = vmul.f32 0.5, %v1069_v58 }
 0x367   : > { %v1071_v62 = vsub.f32 1.5, %v1070_v59 }
 0x369   : > { %v1072_v63 = vmul.f32 %v1755_v54, %v1071_v62 }
 0x36b   : > { %v1076_v36 = vsel %vm1075_vm9, %v1755_v54, %v1072_v63 }
 0x36c   : > { %v1084_v0 = vmul.f32 %v1076_v36, %v2124_v20 }
 0x36e   : > { %v1096_v3 = vmul.f32 %v2134_v43, %v1084_v0 }
 0x370   : > { %v1108_v5 = vadd.f32 %v2141_v39, %v1096_v3 }
 0x372   : > { %v1112_v6 = vpack.c.bf16 %v1108_v5, %v1107_v4 }
 0x374   : > { %1200 = vmatmul.bf16.gmra.mxu3 %v1112_v6 }
 0x37d   : > { %v1186_v7 = vpop.f32.mrf.mxu3 }
 0x37e   : > { %v1206_v8 = vmul.f32 %v1186_v7, %v1186_v7 }
 0x380   : > { %1214 = vadd.xlane.f32.xlu0 %v1206_v8 }
 0x385   : > { %v1188_v1 = vpop.f32.mrf.mxu3 }
 0x386   : > { %v1207_v9 = vmul.f32 %v1188_v1, %v1188_v1 }
 0x388   : > { %1216 = vadd.xlane.f32.xlu1 %v1207_v9 }
 0x38d   : > { %v2168_v10 = vpop.f32.mrf.mxu3 }
 0x38e   : > { %v1208_v20 = vmul.f32 %v2168_v10, %v2168_v10 }
 0x390   : > { %1218 = vadd.xlane.f32.xlu2 %v1208_v20 }
 0x395   : > { %v2172_v11 = vpop.f32.mrf.mxu3 }
 0x396   : > { %v1209_v43 = vmul.f32 %v2172_v11, %v2172_v11 }
 0x398   : > { %1220 = vadd.xlane.f32.xlu0 %v1209_v43 }
 0x39d   : > { %v2176_v39 = vpop.f32.mrf.mxu3 }
 0x39e   : > { %v1210_v13 = vmul.f32 %v2176_v39, %v2176_v39 }
 0x3a0   : > { %1222 = vadd.xlane.f32.xlu1 %v1210_v13 }
 0x3a5   : > { %v2180_v14 = vpop.f32.mrf.mxu3 }
 0x3a6   : > { %v1211_v16 = vmul.f32 %v2180_v14, %v2180_v14 }
 0x3a8   : > { %1224 = vadd.xlane.f32.xlu2 %v1211_v16 }
 0x3f3   : > { %v1215_v12 = vpop.xlane.xlu0 %1214 }
 0x3f4   : > { %v1230_v17 = vadd.f32 1e-12, %v1215_v12 }
 0x3f6   : > { %1756 = vrsqrt.f32 %v1230_v17  ;;  %vm1244_vm11 = vweird.f32 %v1230_v17 }
 0x3f7   : > { %v2184_v18 = vpop.f32.mrf.mxu3 }
 0x3f8   : > { %v1212_v15 = vmul.f32 %v2184_v18, %v2184_v18 }
 0x3fa   : > { %1226 = vadd.xlane.f32.xlu0 %v1212_v15 }
 0x3fb   : > { %v1217_v19 = vpop.xlane.xlu1 %1216 }
 0x3fc   : > { %v1757_v21 = vpop.eup %1756  ;;  %v1231_v22 = vadd.f32 1e-12, %v1217_v19 }
 0x3fd   : > { %v1239_v23 = vmul.f32 %v1757_v21, %v1230_v17  ;;  %vm1245_vm10 = vweird.f32 %v1757_v21 }
 0x3fe   : > { %1758 = vrsqrt.f32 %v1231_v22  ;;  %vm1246_vm12 = vmor %vm1244_vm11, %vm1245_vm10  ;;  %vm1254_vm14 = vweird.f32 %v1231_v22 }
 0x3ff   : > { %v1240_v49 = vmul.f32 %v1757_v21, %v1239_v23  ;;  %v2188_v24 = vpop.f32.mrf.mxu3 }
 0x400   : > { %v1213_v25 = vmul.f32 %v2188_v24, %v2188_v24 }
 0x401   : > { %v1241_v26 = vmul.f32 0.5, %v1240_v49 }
 0x402   : > { %1228 = vadd.xlane.f32.xlu1 %v1213_v25 }
 0x403   : > { %v1242_v27 = vsub.f32 1.5, %v1241_v26  ;;  %v1219_v53 = vpop.xlane.xlu2 %1218 }
 0x404   : > { %v1759_v28 = vpop.eup %1758  ;;  %v1232_v29 = vadd.f32 1e-12, %v1219_v53 }
 0x405   : > { %v1243_v30 = vmul.f32 %v1757_v21, %v1242_v27  ;;  %v1249_v31 = vmul.f32 %v1759_v28, %v1231_v22  ;;  %vm1255_vm13 = vweird.f32 %v1759_v28 }
 0x406   : > { %1760 = vrsqrt.f32 %v1232_v29  ;;  %vm1256_vm15 = vmor %vm1254_vm14, %vm1255_vm13  ;;  %vm1264_vm1 = vweird.f32 %v1232_v29 }
 0x407   : > { %v1247_v32 = vsel %vm1246_vm12, %v1757_v21, %v1243_v30  ;;  %v1250_v33 = vmul.f32 %v1759_v28, %v1249_v31 }
 0x408   : > { %v1318_v34 = vmul.f32 %v1247_v32, %v1186_v7 }
 0x409   : > { %v1251_v35 = vmul.f32 0.5, %v1250_v33 }
 0x40a   : > { %1326 = vst [vmem:[%s2195_s26] sm:$0xff] %v1318_v34 }
 0x40b   : > { %v1252_v37 = vsub.f32 1.5, %v1251_v35  ;;  %v1221_v38 = vpop.xlane.xlu0 %1220 }
 0x40c   : > { %v1761_v40 = vpop.eup %1760  ;;  %v1233_v41 = vadd.f32 1e-12, %v1221_v38 }
 0x40d   : > { %v1253_v42 = vmul.f32 %v1759_v28, %v1252_v37  ;;  %v1259_v57 = vmul.f32 %v1761_v40, %v1232_v29  ;;  %vm1265_vm0 = vweird.f32 %v1761_v40 }
 0x40e   : > { %1762 = vrsqrt.f32 %v1233_v41  ;;  %vm1266_vm2 = vmor %vm1264_vm1, %vm1265_vm0  ;;  %vm1274_vm4 = vweird.f32 %v1233_v41 }
 0x40f   : > { %v1257_v45 = vsel %vm1256_vm15, %v1759_v28, %v1253_v42  ;;  %v1260_v46 = vmul.f32 %v1761_v40, %v1259_v57 }
 0x410   : > { %v1319_v47 = vmul.f32 %v1257_v45, %v1188_v1 }
 0x411   : > { %v1261_v48 = vmul.f32 0.5, %v1260_v46 }
 0x412   : > { %1327 = vst [vmem:[%s2195_s26 + $0x8] sm:$0xff] %v1319_v47 }
 0x413   : > { %v1262_v61 = vsub.f32 1.5, %v1261_v48  ;;  %v1223_v50 = vpop.xlane.xlu1 %1222 }
 0x414   : > { %v1763_v51 = vpop.eup %1762  ;;  %v1234_v52 = vadd.f32 1e-12, %v1223_v50 }
 0x415   : > { %v1263_v54 = vmul.f32 %v1761_v40, %v1262_v61  ;;  %v1269_v55 = vmul.f32 %v1763_v51, %v1233_v41  ;;  %vm1275_vm3 = vweird.f32 %v1763_v51 }
 0x416   : > { %1764 = vrsqrt.f32 %v1234_v52  ;;  %vm1276_vm5 = vmor %vm1274_vm4, %vm1275_vm3  ;;  %vm1284_vm7 = vweird.f32 %v1234_v52 }
 0x417   : > { %v1267_v56 = vsel %vm1266_vm2, %v1761_v40, %v1263_v54  ;;  %v1270_v58 = vmul.f32 %v1763_v51, %v1269_v55 }
 0x418   : > { %v1320_v59 = vmul.f32 %v1267_v56, %v2168_v10 }
 0x419   : > { %v1271_v60 = vmul.f32 0.5, %v1270_v58 }
 0x41a   : > { %1328 = vst [vmem:[%s2195_s26 + $0x10] sm:$0xff] %v1320_v59 }
 0x41b   : > { %v1272_v62 = vsub.f32 1.5, %v1271_v60  ;;  %v1225_v44 = vpop.xlane.xlu2 %1224 }
 0x41c   : > { %v1765_v63 = vpop.eup %1764  ;;  %v1235_v36 = vadd.f32 1e-12, %v1225_v44 }
 0x41d   : > { %v1273_v0 = vmul.f32 %v1763_v51, %v1272_v62  ;;  %v1279_v2 = vmul.f32 %v1765_v63, %v1234_v52  ;;  %vm1285_vm6 = vweird.f32 %v1765_v63 }
 0x41e   : > { %1766 = vrsqrt.f32 %v1235_v36  ;;  %vm1286_vm8 = vmor %vm1284_vm7, %vm1285_vm6  ;;  %vm1294_vm10 = vweird.f32 %v1235_v36 }
 0x41f   : > { %v1277_v3 = vsel %vm1276_vm5, %v1763_v51, %v1273_v0  ;;  %v1280_v4 = vmul.f32 %v1765_v63, %v1279_v2 }
 0x420   : > { %v1321_v5 = vmul.f32 %v1277_v3, %v2172_v11 }
 0x421   : > { %v1281_v6 = vmul.f32 0.5, %v1280_v4 }
 0x422   : > { %1329 = vst [vmem:[%s2195_s26 + $0x18] sm:$0xff] %v1321_v5 }
 0x423   : > { %v1282_v7 = vsub.f32 1.5, %v1281_v6 }
 0x424   : > { %v1767_v8 = vpop.eup %1766 }
 0x425   : > { %v1283_v1 = vmul.f32 %v1765_v63, %v1282_v7  ;;  %v1289_v9 = vmul.f32 %v1767_v8, %v1235_v36  ;;  %vm1295_vm9 = vweird.f32 %v1767_v8 }
 0x426   : > { %vm1296_vm11 = vmor %vm1294_vm10, %vm1295_vm9 }
 0x427   : > { %v1287_v10 = vsel %vm1286_vm8, %v1765_v63, %v1283_v1  ;;  %v1290_v20 = vmul.f32 %v1767_v8, %v1289_v9 }
 0x428   : > { %v1322_v43 = vmul.f32 %v1287_v10, %v2176_v39 }
 0x429   : > { %v1291_v13 = vmul.f32 0.5, %v1290_v20 }
 0x42a   : > { %1330 = vst [vmem:[%s2195_s26 + $0x20] sm:$0xff] %v1322_v43 }
 0x42b   : > { %v1292_v16 = vsub.f32 1.5, %v1291_v13 }
 0x42d   : > { %v1293_v12 = vmul.f32 %v1767_v8, %v1292_v16 }
 0x42f   : > { %v1297_v11 = vsel %vm1296_vm11, %v1767_v8, %v1293_v12 }
 0x430   : > { %v1323_v17 = vmul.f32 %v1297_v11, %v2180_v14 }
 0x432   : > { %1331 = vst [vmem:[%s2195_s26 + $0x28] sm:$0xff] %v1323_v17 }
 0x46d   : > { %v1227_v15 = vpop.xlane.xlu0 %1226 }
 0x46e   : > { %v1236_v19 = vadd.f32 1e-12, %v1227_v15 }
 0x470   : > { %1768 = vrsqrt.f32 %v1236_v19  ;;  %vm1304_vm13 = vweird.f32 %v1236_v19 }
 0x475   : > { %v1229_v21 = vpop.xlane.xlu1 %1228 }
 0x476   : > { %v1769_v22 = vpop.eup %1768  ;;  %v1237_v23 = vadd.f32 1e-12, %v1229_v21 }
 0x477   : > { %v1299_v49 = vmul.f32 %v1769_v22, %v1236_v19  ;;  %vm1305_vm12 = vweird.f32 %v1769_v22 }
 0x478   : > { %1770 = vrsqrt.f32 %v1237_v23  ;;  %vm1306_vm14 = vmor %vm1304_vm13, %vm1305_vm12  ;;  %vm1314_vm0 = vweird.f32 %v1237_v23 }
 0x479   : > { %v1300_v39 = vmul.f32 %v1769_v22, %v1299_v49 }
 0x47b   : > { %v1301_v25 = vmul.f32 0.5, %v1300_v39 }
 0x47d   : > { %v1302_v26 = vsub.f32 1.5, %v1301_v25 }
 0x47e   : > { %v1771_v27 = vpop.eup %1770 }
 0x47f   : > { %v1303_v53 = vmul.f32 %v1769_v22, %v1302_v26  ;;  %v1309_v14 = vmul.f32 %v1771_v27, %v1237_v23  ;;  %vm1315_vm15 = vweird.f32 %v1771_v27 }
 0x480   : > { %vm1316_vm1 = vmor %vm1314_vm0, %vm1315_vm15 }
 0x481   : > { %v1307_v28 = vsel %vm1306_vm14, %v1769_v22, %v1303_v53  ;;  %v1310_v29 = vmul.f32 %v1771_v27, %v1309_v14 }
 0x482   : > { %v1324_v30 = vmul.f32 %v1307_v28, %v2184_v18 }
 0x483   : > { %v1311_v31 = vmul.f32 0.5, %v1310_v29 }
 0x484   : > { %1332 = vst [vmem:[%s2195_s26 + $0x30] sm:$0xff] %v1324_v30 }
 0x485   : > { %v1312_v32 = vsub.f32 1.5, %v1311_v31 }
 0x487   : > { %v1313_v33 = vmul.f32 %v1771_v27, %v1312_v32 }
 0x489   : > { %v1317_v34 = vsel %vm1316_vm1, %v1771_v27, %v1313_v33 }
 0x48a   : > { %v1325_v18 = vmul.f32 %v1317_v34, %v2188_v24 }
 0x48c   : > { %1333 = vst [vmem:[%s2195_s26 + $0x38] sm:$0xff] %v1325_v18 }
 0x48d   : > { %1814 = shalt.err (!%p1811_p9)
}
 0x48e   : > { %s1873_s24 = smov 128   ;;  %s1874_s26 = smov 8  }
 0x48f   : > { %1638 = dma.vmem_to_hbm [thread:$0]  (%p1965_p4), %s1350_s16, 1024, %s1352_s18, %s1335_s12, %s1873_s24, %s1873_s24, %s1874_s26  }
 0x490 PF: > { %p1650_p10 = scmp.ge.s32.totalorder %s1869_s14, 2  ;;  %s1366_s25 = sand.u32 1, %s1849_s30  }
 0x491   : > { %s1367_s27 = scalar_lea.sflag [#allocation3], %s1366_s25 }
 0x492   : > { %p1645_p11 = pnand %p1650_p10, %p1972_p8 }
 0x494   : > { %p1646_p12 = pneg %p1645_p11 }
 0x496   : > { %1844 = dma.done.wait (%p1646_p12), %s1367_s27, 1024  }
 0x497   : > { %1846 = vsyncadd (%p1646_p12), %s1367_s27, 4294966272  ;;  %s23_s14 = sadd.s32 1, %s1869_s14   ;;  %s2264_s30 = smov %s1853_s10 }
 0x498   : > { %p20_p13 = scmp.ge.s32.totalorder %s23_s14, 4   ;;  %s2265_s10 = smov %s1857_s11 }
 0x499   : > { %s2266_s11 = smov %s1978_s22  ;;  %s2267_s12 = smov %s1865_s13 }
 0x49a   : > { %s2268_s13 = smov %s2270_s17  ;;  %22 = sbr.rel (!%p20_p13) target bundleno = 5 (0x5), region = 102 }
 0x49f   :  { %1373 = vsyncpa [#allocation3], 1 }
 0x4a0   :  { %1375 = vsyncpa [#allocation3 + $0x1], 1 }
 0x4a1   :  { %1376 = vsyncpa [#allocation4], 1 }
 0x4a2   :  { %1378 = vsyncpa [#allocation4 + $0x1], 1 }

</bundles_post_ra>
